<compile_context>
chip_gen: v7x
topology: tpu7x:2x2x1
jax: 0.10.0
libtpu: 0.0.40
codegen_flags: <defaults>
</compile_context>

<pallas_src>
import jax
import jax.numpy as jnp
from jax.experimental import pallas as pl
from jax.experimental.pallas import tpu as pltpu


# ---------------------------------------------------------------------------
# Kernel: whole sequence in one invocation
# ---------------------------------------------------------------------------
def char_rnn_kernel(tok_ref,          # (T*B, 1) int32
                    h0_ref,           # (L, B, H) f32
                    emb_gi_ref,       # (Vp, 3H) f32  : embedding @ W_ih[0] + b_ih[0]
                    whh0_ref,         # (H, 3H) f32
                    bhh0_ref,         # (1, 3H) f32
                    wup_ref,          # (max(L-1,1), 2H, 4H) f32 : [rz_ih|n_ih|0 ; rz_hh|0|n_hh]
                    bup_ref,          # (max(L-1,1), 1, 4H) f32
                    wdec_ref,         # (H, OP) f32
                    bdec_ref,         # (1, OP) f32
                    logits_ref,       # (T*B, OP) f32 out
                    hout_ref,         # (L, B, H) f32 out
                    gi0_scr,          # (T*B, 3H) f32 scratch
                    hall_scr):        # (T*B, H)  f32 scratch
    L, B, H = h0_ref.shape
    TB = gi0_scr.shape[0]
    T = TB // B
    Vp = emb_gi_ref.shape[0]

    # ---- Prologue (once): embedding lookup fused with the layer-0 input projection
    # as a single one-hot matmul with M = T*B rows (good MXU row fill, off the
    # sequential path). Out-of-range tokens simply select zero rows (no OOB reads).
    tok = tok_ref[...]                                                   # (TB, 1) i32
    onehot = (tok == jax.lax.broadcasted_iota(jnp.int32, (TB, Vp), 1)
              ).astype(jnp.float32)                                      # (TB, Vp)
    gi0_scr[...] = jnp.dot(onehot, emb_gi_ref[...],
                           preferred_element_type=jnp.float32)           # (TB, 3H)

    def gru_update(rz_pre, gi_n, gh_n, h_prev):
        rz = jax.nn.sigmoid(rz_pre)                                      # (B, 2H)
        r = rz[:, :H]
        z = rz[:, H:]
        n = jnp.tanh(gi_n + r * gh_n)
        return (1.0 - z) * n + z * h_prev                                # PyTorch GRU update

    def step(t, hs):
        off = pl.multiple_of(t * B, B)
        gi0 = gi0_scr[pl.ds(off, B), :]                                  # (B, 3H) precomputed
        # Layer 0: only the hidden-side projection remains on the sequential path.
        gh0 = jnp.dot(hs[0], whh0_ref[...],
                      preferred_element_type=jnp.float32) + bhh0_ref[...]
        h_new = gru_update(gi0[:, :2 * H] + gh0[:, :2 * H],
                           gi0[:, 2 * H:], gh0[:, 2 * H:], hs[0])
        new_hs = [h_new]
        x = h_new
        # Layers 1..L-1: one fused (B, 2H) @ (2H, 4H) matmul per layer per step.
        for l in range(1, L):
            xh = jnp.concatenate([x, hs[l]], axis=1)                     # (B, 2H)
            g = jnp.dot(xh, wup_ref[l - 1],
                        preferred_element_type=jnp.float32) + bup_ref[l - 1]
            h_new = gru_update(g[:, :2 * H], g[:, 2 * H:3 * H], g[:, 3 * H:], hs[l])
            new_hs.append(h_new)
            x = h_new
        hall_scr[pl.ds(off, B), :] = x                                   # stage top-layer output
        return tuple(new_hs)

    hs_init = tuple(h0_ref[l] for l in range(L))
    hs_final = jax.lax.fori_loop(0, T, step, hs_init, unroll=True)

    for l in range(L):
        hout_ref[l] = hs_final[l]

    # ---- Epilogue (once): one lane-dense decoder matmul over all T*B rows.
    logits_ref[...] = (jnp.dot(hall_scr[...], wdec_ref[...],
                               preferred_element_type=jnp.float32) + bdec_ref[...])


# ---------------------------------------------------------------------------
# Wrappers
# ---------------------------------------------------------------------------
def char_rnn_sequence(tokens_seq, hidden, kp):
    """Run T GRU time-steps in ONE pallas_call (single grid point, in-kernel loop).

    tokens_seq: (T, B) int32, hidden: (L, B, H) f32.
    Returns (logits (T, B, O) f32, new hidden (L, B, H) f32).
    """
    T, B = tokens_seq.shape
    L, _, H = hidden.shape
    TB = T * B
    Vp = kp["emb_gi"].shape[0]
    OP = kp["w_dec"].shape[1]
    O = kp["out_size"]
    Lp = kp["w_up"].shape[0]                       # = max(L-1, 1)

    tok_flat = tokens_seq.reshape(TB, 1).astype(jnp.int32)

    flops = int(2 * TB * Vp * 3 * H
                + T * (2 * B * H * 3 * H + (L - 1) * 2 * B * 2 * H * 4 * H)
                + 2 * TB * H * OP)
    transc = int(T * B * L * 3 * H)
    bytes_accessed = int(4 * (tok_flat.size + 2 * hidden.size + kp["emb_gi"].size
                              + kp["w_hh0"].size + kp["b_hh0"].size
                              + kp["w_up"].size + kp["b_up"].size
                              + kp["w_dec"].size + kp["b_dec"].size + TB * OP))

    logits_flat, h_new = pl.pallas_call(
        char_rnn_kernel,
        out_shape=(
            jax.ShapeDtypeStruct((TB, OP), jnp.float32),
            jax.ShapeDtypeStruct((L, B, H), jnp.float32),
        ),
        grid=(1,),
        in_specs=[
            pl.BlockSpec((TB, 1), lambda i: (0, 0)),               # tokens
            pl.BlockSpec((L, B, H), lambda i: (0, 0, 0)),          # h0
            pl.BlockSpec((Vp, 3 * H), lambda i: (0, 0)),           # fused embed+proj table
            pl.BlockSpec((H, 3 * H), lambda i: (0, 0)),            # W_hh layer 0
            pl.BlockSpec((1, 3 * H), lambda i: (0, 0)),            # b_hh layer 0
            pl.BlockSpec((Lp, 2 * H, 4 * H), lambda i: (0, 0, 0)),  # fused upper-layer W
            pl.BlockSpec((Lp, 1, 4 * H), lambda i: (0, 0, 0)),      # fused upper-layer b
            pl.BlockSpec((H, OP), lambda i: (0, 0)),               # decoder W (lane-dense)
            pl.BlockSpec((1, OP), lambda i: (0, 0)),               # decoder b
        ],
        out_specs=(
            pl.BlockSpec((TB, OP), lambda i: (0, 0)),              # all logits, one store
            pl.BlockSpec((L, B, H), lambda i: (0, 0, 0)),          # final hidden
        ),
        scratch_shapes=[
            pltpu.VMEM((TB, 3 * H), jnp.float32),                  # precomputed layer-0 gi
            pltpu.VMEM((TB, H), jnp.float32),                      # staged top-layer outputs
        ],
        compiler_params=pltpu.CompilerParams(
            dimension_semantics=("arbitrary",)),
        cost_estimate=pl.CostEstimate(flops=flops, transcendentals=transc,
                                      bytes_accessed=bytes_accessed),
    )(tok_flat, hidden, kp["emb_gi"], kp["w_hh0"], kp["b_hh0"],
      kp["w_up"], kp["b_up"], kp["w_dec"], kp["b_dec"])

    return logits_flat.reshape(T, B, OP)[:, :, :O], h_new


def char_rnn_forward(tokens, hidden, kp):
    """Single-step forward matching CharRNN.forward(input, hidden)."""
    logits_seq, h_new = char_rnn_sequence(tokens[None, :], hidden, kp)
    return logits_seq[0], h_new


# ---------------------------------------------------------------------------
# Parameters
# ---------------------------------------------------------------------------
def init_params(key, input_size, output_size, hidden_size, n_layers):
    """f32, PyTorch-style (pre-transposed) parameters."""
    ks = jax.random.split(key, 8)
    k = 1.0 / jnp.sqrt(hidden_size)
    return {
        "embedding": jax.random.normal(ks[0], (input_size, hidden_size), jnp.float32),
        # nn.GRU weights, stored transposed (L, H, 3H), gate order r|z|n
        "w_ih_t": jax.random.uniform(ks[1], (n_layers, hidden_size, 3 * hidden_size),
                                     jnp.float32, -k, k),
        "w_hh_t": jax.random.uniform(ks[2], (n_layers, hidden_size, 3 * hidden_size),
                                     jnp.float32, -k, k),
        "b_ih": jax.random.uniform(ks[3], (n_layers, 1, 3 * hidden_size), jnp.float32, -k, k),
        "b_hh": jax.random.uniform(ks[4], (n_layers, 1, 3 * hidden_size), jnp.float32, -k, k),
        "w_dec_t": jax.random.uniform(ks[5], (hidden_size, output_size), jnp.float32, -k, k),
        "b_dec": jax.random.uniform(ks[6], (1, output_size), jnp.float32, -k, k),
    }


def pack_params(p):
    """Re-layout f32 params into the kernel's fused / padded layout (all f32)."""
    L, H, H3 = p["w_ih_t"].shape
    assert H3 == 3 * H
    O = p["w_dec_t"].shape[1]
    OP = ((O + 127) // 128) * 128                  # lane-dense decoder width
    V = p["embedding"].shape[0]
    Vp = ((V + 127) // 128) * 128                  # one-hot contraction dim, MXU friendly

    # Embedding lookup fused with the layer-0 input projection (+ input bias):
    # emb_gi[v] = embedding[v] @ W_ih[0] + b_ih[0]
    emb_gi = p["embedding"] @ p["w_ih_t"][0] + p["b_ih"][0]              # (V, 3H)
    emb_gi = jnp.pad(emb_gi, ((0, Vp - V), (0, 0)))

    # Upper layers: one fused (2H, 4H) matmul per layer per step.
    # Column blocks: [ rz (ih + hh) | n_ih | n_hh ]
    zeros = jnp.zeros((H, H), jnp.float32)
    w_up, b_up = [], []
    for l in range(1, L):
        wih, whh = p["w_ih_t"][l], p["w_hh_t"][l]
        top = jnp.concatenate([wih[:, :2 * H], wih[:, 2 * H:], zeros], axis=1)   # (H, 4H)
        bot = jnp.concatenate([whh[:, :2 * H], zeros, whh[:, 2 * H:]], axis=1)   # (H, 4H)
        w_up.append(jnp.concatenate([top, bot], axis=0))                          # (2H, 4H)
        b_up.append(jnp.concatenate(
            [p["b_ih"][l][:, :2 * H] + p["b_hh"][l][:, :2 * H],
             p["b_ih"][l][:, 2 * H:], p["b_hh"][l][:, 2 * H:]], axis=1))          # (1, 4H)
    if w_up:
        w_up = jnp.stack(w_up)
        b_up = jnp.stack(b_up)
    else:  # L == 1: dummy blocks, never indexed by the kernel
        w_up = jnp.zeros((1, 2 * H, 4 * H), jnp.float32)
        b_up = jnp.zeros((1, 1, 4 * H), jnp.float32)

    return {
        "emb_gi": emb_gi.astype(jnp.float32),
        "w_hh0": p["w_hh_t"][0].astype(jnp.float32),
        "b_hh0": p["b_hh"][0].astype(jnp.float32),
        "w_up": w_up.astype(jnp.float32),
        "b_up": b_up.astype(jnp.float32),
        "w_dec": jnp.pad(p["w_dec_t"], ((0, 0), (0, OP - O))).astype(jnp.float32),
        "b_dec": jnp.pad(p["b_dec"], ((0, 0), (0, OP - O))).astype(jnp.float32),
        "out_size": int(O),
    }


# ---------------------------------------------------------------------------
# Pure-JAX f32 reference (PyTorch CharRNN applied step-by-step)
# ---------------------------------------------------------------------------
def char_rnn_reference(tokens_seq, hidden, params):
    H = params["embedding"].shape[1]
    h = hidden
    logits_all = []
    for t in range(tokens_seq.shape[0]):
        x = params["embedding"][tokens_seq[t]]
        new_h = []
        for l in range(h.shape[0]):
            hl = h[l]
            gi = x @ params["w_ih_t"][l] + params["b_ih"][l]
            gh = hl @ params["w_hh_t"][l] + params["b_hh"][l]
            r = jax.nn.sigmoid(gi[:, :H] + gh[:, :H])
            z = jax.nn.sigmoid(gi[:, H:2 * H] + gh[:, H:2 * H])
            n = jnp.tanh(gi[:, 2 * H:] + r * gh[:, 2 * H:])
            hl = (1.0 - z) * n + z * hl
            new_h.append(hl)
            x = hl
        h = jnp.stack(new_h)
        logits_all.append(x @ params["w_dec_t"] + params["b_dec"])
    return jnp.stack(logits_all), h


if __name__ == "__main__":
    VOCAB = 65        # input_size == output_size (char vocab)
    HIDDEN = 128      # module default hidden_size
    N_LAYERS = 2      # module default n_layers
    BATCH = 8
    SEQ = 16          # fused time-steps in one pallas_call

    key = jax.random.PRNGKey(0)
    k_par, k_tok = jax.random.split(key)
    params = init_params(k_par, VOCAB, VOCAB, HIDDEN, N_LAYERS)
    kparams = pack_params(params)

    hidden = jnp.zeros((N_LAYERS, BATCH, HIDDEN), jnp.float32)           # init_hidden
    tokens_seq = jax.random.randint(k_tok, (SEQ, BATCH), 0, VOCAB, dtype=jnp.int32)

    # --- single-step forward (exact module semantics) ---
    logits1, h1 = jax.block_until_ready(char_rnn_forward(tokens_seq[0], hidden, kparams))
    ref_l1, ref_h1 = char_rnn_reference(tokens_seq[:1], hidden, params)
    assert logits1.shape == (BATCH, VOCAB) and h1.shape == (N_LAYERS, BATCH, HIDDEN)
    assert jnp.allclose(logits1, ref_l1[0], atol=2e-2, rtol=2e-2)
    assert jnp.allclose(h1, ref_h1, atol=2e-2, rtol=2e-2)

    # --- fused multi-step sequence (single grid point, in-kernel time loop) ---
    logits_seq, h_seq = jax.block_until_ready(char_rnn_sequence(tokens_seq, hidden, kparams))
    ref_lseq, ref_hseq = char_rnn_reference(tokens_seq, hidden, params)
    assert logits_seq.shape == (SEQ, BATCH, VOCAB) and h_seq.shape == (N_LAYERS, BATCH, HIDDEN)
    assert jnp.allclose(logits_seq, ref_lseq, atol=2e-2, rtol=2e-2)
    assert jnp.allclose(h_seq, ref_hseq, atol=2e-2, rtol=2e-2)

    print("KERNEL_OK")
</pallas_src>

<mosaic_0001>
module attributes {stable_mosaic.version = 11 : i64} {
  func.func @char_rnn_kernel(%arg0: i32, %arg1: memref<8x1xi32, #tpu.memory_space<vmem>>, %arg2: memref<2x8x128xf32, #tpu.memory_space<vmem>>, %arg3: memref<128x384xf32, #tpu.memory_space<vmem>>, %arg4: memref<128x384xf32, #tpu.memory_space<vmem>>, %arg5: memref<1x384xf32, #tpu.memory_space<vmem>>, %arg6: memref<1x256x512xf32, #tpu.memory_space<vmem>>, %arg7: memref<1x1x512xf32, #tpu.memory_space<vmem>>, %arg8: memref<128x128xf32, #tpu.memory_space<vmem>>, %arg9: memref<1x128xf32, #tpu.memory_space<vmem>>, %arg10: memref<8x128xf32, #tpu.memory_space<vmem>>, %arg11: memref<2x8x128xf32, #tpu.memory_space<vmem>>, %arg12: memref<8x384xf32, #tpu.memory_space<vmem>>, %arg13: memref<8x128xf32, #tpu.memory_space<vmem>>) attributes {dimension_semantics = [#tpu.dimension_semantics<arbitrary>], iteration_bounds = array<i64: 1>, scalar_prefetch = 0 : i64, scratch_operands = 2 : i64, tpu.core_type = #tpu.core_type<tc>, window_params = [{pipeline_mode = #tpu.pipeline_mode<synchronous>, transform_indices = @transform_0, window_bounds = array<i64: 8, 1>}, {pipeline_mode = #tpu.pipeline_mode<synchronous>, transform_indices = @transform_1, window_bounds = array<i64: 2, 8, 128>}, {pipeline_mode = #tpu.pipeline_mode<synchronous>, transform_indices = @transform_2, window_bounds = array<i64: 128, 384>}, {pipeline_mode = #tpu.pipeline_mode<synchronous>, transform_indices = @transform_3, window_bounds = array<i64: 128, 384>}, {pipeline_mode = #tpu.pipeline_mode<synchronous>, transform_indices = @transform_4, window_bounds = array<i64: 1, 384>}, {pipeline_mode = #tpu.pipeline_mode<synchronous>, transform_indices = @transform_5, window_bounds = array<i64: 1, 256, 512>}, {pipeline_mode = #tpu.pipeline_mode<synchronous>, transform_indices = @transform_6, window_bounds = array<i64: 1, 1, 512>}, {pipeline_mode = #tpu.pipeline_mode<synchronous>, transform_indices = @transform_7, window_bounds = array<i64: 128, 128>}, {pipeline_mode = #tpu.pipeline_mode<synchronous>, transform_indices = @transform_8, window_bounds = array<i64: 1, 128>}, {pipeline_mode = #tpu.pipeline_mode<synchronous>, transform_indices = @transform_9, window_bounds = array<i64: 8, 128>}, {pipeline_mode = #tpu.pipeline_mode<synchronous>, transform_indices = @transform_10, window_bounds = array<i64: 2, 8, 128>}]} {
    %c0 = arith.constant 0 : index
    %c0_0 = arith.constant 0 : index
    %0 = vector.load %arg1[%c0, %c0_0] : memref<8x1xi32, #tpu.memory_space<vmem>>, vector<8x1xi32>
    %1 = tpu.iota {dimensions = array<i32: 1>} : vector<8x128xi32>
    %2 = vector.broadcast %0 : vector<8x1xi32> to vector<8x128xi32>
    %3 = arith.cmpi eq, %2, %1 : vector<8x128xi32>
    %4 = arith.extui %3 : vector<8x128xi1> to vector<8x128xi32>
    %5 = arith.sitofp %4 : vector<8x128xi32> to vector<8x128xf32>
    %c0_1 = arith.constant 0 : index
    %c0_2 = arith.constant 0 : index
    %6 = vector.load %arg3[%c0_1, %c0_2] : memref<128x384xf32, #tpu.memory_space<vmem>>, vector<128x384xf32>
    %cst = arith.constant dense<0.000000e+00> : vector<8x384xf32>
    %7 = tpu.matmul %5, %6, %cst {dimension_numbers = #tpu.dot_dimension_numbers<[1], [0], [0], [1], [0, 0, 1, 1], [], []>} : vector<8x128xf32>, vector<128x384xf32>, vector<8x384xf32> -> vector<8x384xf32>
    %c0_3 = arith.constant 0 : index
    %c0_4 = arith.constant 0 : index
    %8 = vector.load %arg12[%c0_3, %c0_4] : memref<8x384xf32, #tpu.memory_space<vmem>>, vector<8x384xf32>
    tpu.vector_store %arg12[%c0_3, %c0_4], %7 {strides = array<i32>} : memref<8x384xf32, #tpu.memory_space<vmem>>, vector<8x384xf32>,
    %c0_5 = arith.constant 0 : index
    %c0_6 = arith.constant 0 : index
    %c0_7 = arith.constant 0 : index
    %9 = vector.load %arg2[%c0_5, %c0_6, %c0_7] : memref<2x8x128xf32, #tpu.memory_space<vmem>>, vector<1x8x128xf32>
    %10 = vector.shape_cast %9 : vector<1x8x128xf32> to vector<8x128xf32>
    %c1 = arith.constant 1 : index
    %c0_8 = arith.constant 0 : index
    %c0_9 = arith.constant 0 : index
    %11 = vector.load %arg2[%c1, %c0_8, %c0_9] : memref<2x8x128xf32, #tpu.memory_space<vmem>>, vector<1x8x128xf32>
    %12 = vector.shape_cast %11 : vector<1x8x128xf32> to vector<8x128xf32>
    %c0_i32 = arith.constant 0 : i32
    %c8_i32 = arith.constant 8 : i32
    %13 = arith.muli %c0_i32, %c8_i32 : i32
    %14 = tpu.assume_multiple %13, 8 : i32
    %15 = arith.index_cast %14 : i32 to index
    %c0_10 = arith.constant 0 : index
    %16 = vector.load %arg12[%15, %c0_10] : memref<8x384xf32, #tpu.memory_space<vmem>>, vector<8x384xf32>
    %c0_11 = arith.constant 0 : index
    %c0_12 = arith.constant 0 : index
    %17 = vector.load %arg4[%c0_11, %c0_12] : memref<128x384xf32, #tpu.memory_space<vmem>>, vector<128x384xf32>
    %cst_13 = arith.constant dense<0.000000e+00> : vector<8x384xf32>
    %18 = tpu.matmul %10, %17, %cst_13 {dimension_numbers = #tpu.dot_dimension_numbers<[1], [0], [0], [1], [0, 0, 1, 1], [], []>} : vector<8x128xf32>, vector<128x384xf32>, vector<8x384xf32> -> vector<8x384xf32>
    %c0_14 = arith.constant 0 : index
    %c0_15 = arith.constant 0 : index
    %19 = vector.load %arg5[%c0_14, %c0_15] : memref<1x384xf32, #tpu.memory_space<vmem>>, vector<1x384xf32>
    %20 = vector.broadcast %19 : vector<1x384xf32> to vector<8x384xf32>
    %21 = arith.addf %18, %20 : vector<8x384xf32>
    %22 = vector.extract_strided_slice %16 {offsets = [0, 0], sizes = [8, 256], strides = [1, 1]} : vector<8x384xf32> to vector<8x256xf32>
    %23 = vector.extract_strided_slice %21 {offsets = [0, 0], sizes = [8, 256], strides = [1, 1]} : vector<8x384xf32> to vector<8x256xf32>
    %24 = arith.addf %22, %23 : vector<8x256xf32>
    %25 = vector.extract_strided_slice %16 {offsets = [0, 256], sizes = [8, 128], strides = [1, 1]} : vector<8x384xf32> to vector<8x128xf32>
    %26 = vector.extract_strided_slice %21 {offsets = [0, 256], sizes = [8, 128], strides = [1, 1]} : vector<8x384xf32> to vector<8x128xf32>
    %27 = arith.negf %24 : vector<8x256xf32>
    %28 = math.exp %27 : vector<8x256xf32>
    %cst_16 = arith.constant 1.000000e+00 : f32
    %29 = vector.broadcast %cst_16 : f32 to vector<8x256xf32>
    %30 = arith.addf %29, %28 : vector<8x256xf32>
    %31 = arith.divf %29, %30 : vector<8x256xf32>
    %32 = vector.extract_strided_slice %31 {offsets = [0, 0], sizes = [8, 128], strides = [1, 1]} : vector<8x256xf32> to vector<8x128xf32>
    %33 = vector.extract_strided_slice %31 {offsets = [0, 128], sizes = [8, 128], strides = [1, 1]} : vector<8x256xf32> to vector<8x128xf32>
    %34 = arith.mulf %32, %26 : vector<8x128xf32>
    %35 = arith.addf %25, %34 : vector<8x128xf32>
    %36 = math.tanh %35 : vector<8x128xf32>
    %cst_17 = arith.constant 1.000000e+00 : f32
    %37 = vector.broadcast %cst_17 : f32 to vector<8x128xf32>
    %38 = arith.subf %37, %33 : vector<8x128xf32>
    %39 = arith.mulf %38, %36 : vector<8x128xf32>
    %40 = arith.mulf %33, %10 : vector<8x128xf32>
    %41 = arith.addf %39, %40 : vector<8x128xf32>
    %42 = tpu.concatenate %41, %12 in 1 : vector<8x128xf32>, vector<8x128xf32> -> vector<8x256xf32>
    %c0_18 = arith.constant 0 : index
    %c0_19 = arith.constant 0 : index
    %c0_20 = arith.constant 0 : index
    %43 = vector.load %arg6[%c0_18, %c0_19, %c0_20] : memref<1x256x512xf32, #tpu.memory_space<vmem>>, vector<1x256x512xf32>
    %44 = vector.shape_cast %43 : vector<1x256x512xf32> to vector<256x512xf32>
    %cst_21 = arith.constant dense<0.000000e+00> : vector<8x512xf32>
    %45 = tpu.matmul %42, %44, %cst_21 {dimension_numbers = #tpu.dot_dimension_numbers<[1], [0], [0], [1], [0, 0, 1, 1], [], []>} : vector<8x256xf32>, vector<256x512xf32>, vector<8x512xf32> -> vector<8x512xf32>
    %c0_22 = arith.constant 0 : index
    %c0_23 = arith.constant 0 : index
    %c0_24 = arith.constant 0 : index
    %46 = vector.load %arg7[%c0_22, %c0_23, %c0_24] : memref<1x1x512xf32, #tpu.memory_space<vmem>>, vector<1x1x512xf32>
    %47 = vector.shape_cast %46 : vector<1x1x512xf32> to vector<1x512xf32>
    %48 = vector.broadcast %47 : vector<1x512xf32> to vector<8x512xf32>
    %49 = arith.addf %45, %48 : vector<8x512xf32>
    %50 = vector.extract_strided_slice %49 {offsets = [0, 0], sizes = [8, 256], strides = [1, 1]} : vector<8x512xf32> to vector<8x256xf32>
    %51 = vector.extract_strided_slice %49 {offsets = [0, 256], sizes = [8, 128], strides = [1, 1]} : vector<8x512xf32> to vector<8x128xf32>
    %52 = vector.extract_strided_slice %49 {offsets = [0, 384], sizes = [8, 128], strides = [1, 1]} : vector<8x512xf32> to vector<8x128xf32>
    %53 = arith.negf %50 : vector<8x256xf32>
    %54 = math.exp %53 : vector<8x256xf32>
    %cst_25 = arith.constant 1.000000e+00 : f32
    %55 = vector.broadcast %cst_25 : f32 to vector<8x256xf32>
    %56 = arith.addf %55, %54 : vector<8x256xf32>
    %57 = arith.divf %55, %56 : vector<8x256xf32>
    %58 = vector.extract_strided_slice %57 {offsets = [0, 0], sizes = [8, 128], strides = [1, 1]} : vector<8x256xf32> to vector<8x128xf32>
    %59 = vector.extract_strided_slice %57 {offsets = [0, 128], sizes = [8, 128], strides = [1, 1]} : vector<8x256xf32> to vector<8x128xf32>
    %60 = arith.mulf %58, %52 : vector<8x128xf32>
    %61 = arith.addf %51, %60 : vector<8x128xf32>
    %62 = math.tanh %61 : vector<8x128xf32>
    %cst_26 = arith.constant 1.000000e+00 : f32
    %63 = vector.broadcast %cst_26 : f32 to vector<8x128xf32>
    %64 = arith.subf %63, %59 : vector<8x128xf32>
    %65 = arith.mulf %64, %62 : vector<8x128xf32>
    %66 = arith.mulf %59, %12 : vector<8x128xf32>
    %67 = arith.addf %65, %66 : vector<8x128xf32>
    %68 = arith.index_cast %14 : i32 to index
    %c0_27 = arith.constant 0 : index
    %69 = vector.load %arg13[%68, %c0_27] : memref<8x128xf32, #tpu.memory_space<vmem>>, vector<8x128xf32>
    tpu.vector_store %arg13[%68, %c0_27], %67 {strides = array<i32>} : memref<8x128xf32, #tpu.memory_space<vmem>>, vector<8x128xf32>,
    %c1_i32 = arith.constant 1 : i32
    %c0_28 = arith.constant 0 : index
    %c0_29 = arith.constant 0 : index
    %c0_30 = arith.constant 0 : index
    %70 = vector.load %arg11[%c0_28, %c0_29, %c0_30] : memref<2x8x128xf32, #tpu.memory_space<vmem>>, vector<1x8x128xf32>
    %71 = vector.shape_cast %70 : vector<1x8x128xf32> to vector<8x128xf32>
    %72 = vector.shape_cast %41 : vector<8x128xf32> to vector<1x8x128xf32>
    tpu.vector_store %arg11[%c0_28, %c0_29, %c0_30], %72 {strides = array<i32>} : memref<2x8x128xf32, #tpu.memory_space<vmem>>, vector<1x8x128xf32>,
    %c1_31 = arith.constant 1 : index
    %c0_32 = arith.constant 0 : index
    %c0_33 = arith.constant 0 : index
    %73 = vector.load %arg11[%c1_31, %c0_32, %c0_33] : memref<2x8x128xf32, #tpu.memory_space<vmem>>, vector<1x8x128xf32>
    %74 = vector.shape_cast %73 : vector<1x8x128xf32> to vector<8x128xf32>
    %75 = vector.shape_cast %67 : vector<8x128xf32> to vector<1x8x128xf32>
    tpu.vector_store %arg11[%c1_31, %c0_32, %c0_33], %75 {strides = array<i32>} : memref<2x8x128xf32, #tpu.memory_space<vmem>>, vector<1x8x128xf32>,
    %c0_34 = arith.constant 0 : index
    %c0_35 = arith.constant 0 : index
    %76 = vector.load %arg13[%c0_34, %c0_35] : memref<8x128xf32, #tpu.memory_space<vmem>>, vector<8x128xf32>
    %c0_36 = arith.constant 0 : index
    %c0_37 = arith.constant 0 : index
    %77 = vector.load %arg8[%c0_36, %c0_37] : memref<128x128xf32, #tpu.memory_space<vmem>>, vector<128x128xf32>
    %cst_38 = arith.constant dense<0.000000e+00> : vector<8x128xf32>
    %78 = tpu.matmul %76, %77, %cst_38 {dimension_numbers = #tpu.dot_dimension_numbers<[1], [0], [0], [1], [0, 0, 1, 1], [], []>} : vector<8x128xf32>, vector<128x128xf32>, vector<8x128xf32> -> vector<8x128xf32>
    %c0_39 = arith.constant 0 : index
    %c0_40 = arith.constant 0 : index
    %79 = vector.load %arg9[%c0_39, %c0_40] : memref<1x128xf32, #tpu.memory_space<vmem>>, vector<1x128xf32>
    %80 = vector.broadcast %79 : vector<1x128xf32> to vector<8x128xf32>
    %81 = arith.addf %78, %80 : vector<8x128xf32>
    %c0_41 = arith.constant 0 : index
    %c0_42 = arith.constant 0 : index
    %82 = vector.load %arg10[%c0_41, %c0_42] : memref<8x128xf32, #tpu.memory_space<vmem>>, vector<8x128xf32>
    tpu.vector_store %arg10[%c0_41, %c0_42], %81 {strides = array<i32>} : memref<8x128xf32, #tpu.memory_space<vmem>>, vector<8x128xf32>,
    return
  }
  func.func @transform_0(%arg0: i32) -> (i32, i32) {
    %c0_i32 = arith.constant 0 : i32
    %c0_i32_0 = arith.constant 0 : i32
    %c0_i32_1 = arith.constant 0 : i32
    return %c0_i32, %c0_i32_0 : i32, i32
  }
  func.func @transform_1(%arg0: i32) -> (i32, i32, i32) {
    %c0_i32 = arith.constant 0 : i32
    %c0_i32_0 = arith.constant 0 : i32
    %c0_i32_1 = arith.constant 0 : i32
    %c0_i32_2 = arith.constant 0 : i32
    return %c0_i32, %c0_i32_0, %c0_i32_1 : i32, i32, i32
  }
  func.func @transform_2(%arg0: i32) -> (i32, i32) {
    %c0_i32 = arith.constant 0 : i32
    %c0_i32_0 = arith.constant 0 : i32
    %c0_i32_1 = arith.constant 0 : i32
    return %c0_i32, %c0_i32_0 : i32, i32
  }
  func.func @transform_3(%arg0: i32) -> (i32, i32) {
    %c0_i32 = arith.constant 0 : i32
    %c0_i32_0 = arith.constant 0 : i32
    %c0_i32_1 = arith.constant 0 : i32
    return %c0_i32, %c0_i32_0 : i32, i32
  }
  func.func @transform_4(%arg0: i32) -> (i32, i32) {
    %c0_i32 = arith.constant 0 : i32
    %c0_i32_0 = arith.constant 0 : i32
    %c0_i32_1 = arith.constant 0 : i32
    return %c0_i32, %c0_i32_0 : i32, i32
  }
  func.func @transform_5(%arg0: i32) -> (i32, i32, i32) {
    %c0_i32 = arith.constant 0 : i32
    %c0_i32_0 = arith.constant 0 : i32
    %c0_i32_1 = arith.constant 0 : i32
    %c0_i32_2 = arith.constant 0 : i32
    return %c0_i32, %c0_i32_0, %c0_i32_1 : i32, i32, i32
  }
  func.func @transform_6(%arg0: i32) -> (i32, i32, i32) {
    %c0_i32 = arith.constant 0 : i32
    %c0_i32_0 = arith.constant 0 : i32
    %c0_i32_1 = arith.constant 0 : i32
    %c0_i32_2 = arith.constant 0 : i32
    return %c0_i32, %c0_i32_0, %c0_i32_1 : i32, i32, i32
  }
  func.func @transform_7(%arg0: i32) -> (i32, i32) {
    %c0_i32 = arith.constant 0 : i32
    %c0_i32_0 = arith.constant 0 : i32
    %c0_i32_1 = arith.constant 0 : i32
    return %c0_i32, %c0_i32_0 : i32, i32
  }
  func.func @transform_8(%arg0: i32) -> (i32, i32) {
    %c0_i32 = arith.constant 0 : i32
    %c0_i32_0 = arith.constant 0 : i32
    %c0_i32_1 = arith.constant 0 : i32
    return %c0_i32, %c0_i32_0 : i32, i32
  }
  func.func @transform_9(%arg0: i32) -> (i32, i32) {
    %c0_i32 = arith.constant 0 : i32
    %c0_i32_0 = arith.constant 0 : i32
    %c0_i32_1 = arith.constant 0 : i32
    return %c0_i32, %c0_i32_0 : i32, i32
  }
  func.func @transform_10(%arg0: i32) -> (i32, i32, i32) {
    %c0_i32 = arith.constant 0 : i32
    %c0_i32_0 = arith.constant 0 : i32
    %c0_i32_1 = arith.constant 0 : i32
    %c0_i32_2 = arith.constant 0 : i32
    return %c0_i32, %c0_i32_0, %c0_i32_1 : i32, i32, i32
  }
}

</mosaic_0001>

<bundles_post_ra>
// kernel: tpu_custom_call.1
= control target key start
LH: loop header
LB: loop body
LE: loop exit
PB: predicated region body
PF: predicated region fallthrough
CT: control target
= control target key end

     0   :  { %16 = vsyncpa [#allocation5], 0  ;;  %s1865_s0 = inlined_call_operand.vmem [shape: s32[8,1], index: 0, kind: input, shape index: {}]   ;;  %s1866_s1 = inlined_call_operand.hbm [shape: f32[2,8,128], index: 1, kind: input, shape index: {}]   ;;  %s1867_s2 = inlined_call_operand.hbm [shape: f32[128,384], index: 2, kind: input, shape index: {}]   ;;  %s1868_s3 = inlined_call_operand.hbm [shape: f32[128,384], index: 3, kind: input, shape index: {}]   ;;  %s1869_s4 = inlined_call_operand.vmem [shape: f32[1,384], index: 4, kind: input, shape index: {}]   ;;  %s1870_s5 = inlined_call_operand.hbm [shape: f32[1,256,512], index: 5, kind: input, shape index: {}]   ;;  %s1871_s6 = inlined_call_operand.vmem [shape: f32[1,1,512], index: 6, kind: input, shape index: {}]   ;;  %s1872_s7 = inlined_call_operand.hbm [shape: f32[128,128], index: 7, kind: input, shape index: {}]   ;;  %s1873_s8 = inlined_call_operand.vmem [shape: f32[1,128], index: 8, kind: input, shape index: {}]   ;;  %s1874_s9 = inlined_call_operand.hbm [shape: f32[8,128], index: 9, kind: output, shape index: {0}]   ;;  %s1875_s10 = inlined_call_operand.hbm [shape: f32[2,8,128], index: 10, kind: output, shape index: {1}]  }
   0x1   :  { %17 = vsyncpa [#allocation8], 0 }
   0x2   :  { %18 = vsyncpa [#allocation11], 0 }
   0x3   :  { %19 = vsyncpa [#allocation6], 0 }
   0x4   :  { %20 = vsyncpa [#allocation15], 0  ;;  %s1619_s13 = smov [#allocation7]   ;;  %s1455_s17 = scalar_lea.hbm %s1867_s2, 6144 }
   0x5   :  { %s40_s14 = sshll.u32 %s1619_s13, 4  ;;  %p1456_p0 = scmp.ne.s32.totalorder %s1867_s2, %s1455_s17  ;;  %s41_s14 = int_to_ptr.vmem [resolvable:$true] %s40_s14 }
   0x6   :  { %p1459_p1 = scmp.lt.u32.totalorder %s1455_s17, %s1867_s2 }
   0x8   :  { %p1461_p2 = pnand %p1459_p1, %p1456_p0 }
   0xa   :  { %1464 = shalt.err (!%p1461_p2)
}
   0xb   :  { %s1465_s22 = scalar_lea.vmem %s41_s14, 6144  ;;  %p1470_p4 = scmp.lt.s32.totalorder %s41_s14, %s41_s14 }
   0xc   :  { %p1466_p3 = scmp.ne.s32.totalorder %s41_s14, %s1465_s22  ;;  %p1471_p5 = scmp.lt.s32.totalorder %s1465_s22, %s1465_s22 }
   0xe   :  { %p1472_p6 = por %p1471_p5, %p1470_p4 }
  0x10   :  { %p1473_p7 = pnand %p1472_p6, %p1466_p3 }
  0x12   :  { %1476 = shalt.err (!%p1473_p7)
}
  0x13   :  { %s1620_s23 = smov 384   ;;  %s1621_s24 = smov 24  }
  0x14   :  { %46 = dma.hbm_to_vmem [thread:$0]  %s1867_s2, 6144, %s41_s14, [#allocation8], %s1620_s23, %s1620_s23, %s1621_s24  }
  0x15   :  { %s1622_s27 = smov [#allocation10]   ;;  %s1477_s11 = scalar_lea.hbm %s1870_s5, 16384 }
  0x16   :  { %s66_s28 = sshll.u32 %s1622_s27, 4  ;;  %p1478_p8 = scmp.ne.s32.totalorder %s1870_s5, %s1477_s11  ;;  %s67_s28 = int_to_ptr.vmem [resolvable:$true] %s66_s28 }
  0x17   :  { %p1481_p9 = scmp.lt.u32.totalorder %s1477_s11, %s1870_s5 }
  0x19   :  { %p1483_p10 = pnand %p1481_p9, %p1478_p8 }
  0x1b   :  { %1486 = shalt.err (!%p1483_p10)
}
  0x1c   :  { %s1487_s17 = scalar_lea.vmem %s67_s28, 16384  ;;  %p1492_p12 = scmp.lt.s32.totalorder %s67_s28, %s67_s28 }
  0x1d   :  { %p1488_p11 = scmp.ne.s32.totalorder %s67_s28, %s1487_s17  ;;  %p1493_p13 = scmp.lt.s32.totalorder %s1487_s17, %s1487_s17 }
  0x1f   :  { %p1494_p0 = por %p1493_p13, %p1492_p12 }
  0x21   :  { %p1495_p1 = pnand %p1494_p0, %p1488_p11 }
  0x23   :  { %1498 = shalt.err (!%p1495_p1)
}
  0x24   :  { %s1623_s2 = smov 512   ;;  %s1624_s14 = smov 32  }
  0x25   :  { %72 = dma.hbm_to_vmem [thread:$0]  %s1870_s5, 16384, %s67_s28, [#allocation11], %s1623_s2, %s1623_s2, %s1624_s14  }
  0x26   :  { %s1625_s20 = smov [#allocation4]   ;;  %s1499_s26 = scalar_lea.hbm %s1866_s1, 256 }
  0x27   :  { %s28_s21 = sshll.u32 %s1625_s20, 4  ;;  %p1500_p2 = scmp.ne.s32.totalorder %s1866_s1, %s1499_s26  ;;  %s29_s21 = int_to_ptr.vmem [resolvable:$true] %s28_s21 }
  0x28   :  { %p1503_p3 = scmp.lt.u32.totalorder %s1499_s26, %s1866_s1 }
  0x2a   :  { %p1505_p4 = pnand %p1503_p3, %p1500_p2 }
  0x2c   :  { %1508 = shalt.err (!%p1505_p4)
}
  0x2d   :  { %s1509_s12 = scalar_lea.vmem %s29_s21, 256  ;;  %p1514_p6 = scmp.lt.s32.totalorder %s29_s21, %s29_s21 }
  0x2e   :  { %p1510_p5 = scmp.ne.s32.totalorder %s29_s21, %s1509_s12  ;;  %p1515_p7 = scmp.lt.s32.totalorder %s1509_s12, %s1509_s12 }
  0x30   :  { %p1516_p8 = por %p1515_p7, %p1514_p6 }
  0x32   :  { %p1517_p9 = pnand %p1516_p8, %p1510_p5 }
  0x34   :  { %1520 = shalt.err (!%p1517_p9)
}
  0x35   :  { %s1626_s5 = smov 128   ;;  %s1627_s28 = smov 8  }
  0x36   :  { %34 = dma.hbm_to_vmem [thread:$0]  %s1866_s1, 256, %s29_s21, [#allocation5], %s1626_s5, %s1626_s5, %s1627_s28  }
  0x37   :  { %s1628_s16 = smov [#allocation9]   ;;  %s1629_s2 = smov [#allocation12]  }
  0x38   :  { %s52_s17 = sshll.u32 %s1628_s16, 4  ;;  %s80_s14 = sshll.u32 %s1629_s2, 4  ;;  %s53_s17 = int_to_ptr.vmem [resolvable:$true] %s52_s17  ;;  %s81_s14 = int_to_ptr.vmem [resolvable:$true] %s80_s14 }
  0x39   :  { %s1521_s20 = scalar_lea.hbm %s1868_s3, 6144 }
  0x3a   :  { %p1522_p10 = scmp.ne.s32.totalorder %s1868_s3, %s1521_s20  ;;  %p1525_p11 = scmp.lt.u32.totalorder %s1521_s20, %s1868_s3 }
  0x3c   :  { %p1527_p12 = pnand %p1525_p11, %p1522_p10 }
  0x3e   :  { %1530 = shalt.err (!%p1527_p12)
}
  0x3f   :  { %s1531_s1 = scalar_lea.vmem %s53_s17, 6144  ;;  %p1536_p0 = scmp.lt.s32.totalorder %s53_s17, %s53_s17 }
  0x40   :  { %p1532_p13 = scmp.ne.s32.totalorder %s53_s17, %s1531_s1  ;;  %p1537_p1 = scmp.lt.s32.totalorder %s1531_s1, %s1531_s1 }
  0x42   :  { %p1538_p2 = por %p1537_p1, %p1536_p0 }
  0x44   :  { %p1539_p3 = pnand %p1538_p2, %p1532_p13 }
  0x46   :  { %1542 = shalt.err (!%p1539_p3)
}
  0x47   :  { %58 = dma.hbm_to_vmem [thread:$0]  %s1868_s3, 6144, %s53_s17, [#allocation8], %s1620_s23, %s1620_s23, %s1621_s24  }
  0x48   :  { %s1543_s12 = scalar_lea.hbm %s1872_s7, 2048 }
  0x49   :  { %p1544_p4 = scmp.ne.s32.totalorder %s1872_s7, %s1543_s12  ;;  %p1547_p5 = scmp.lt.u32.totalorder %s1543_s12, %s1872_s7 }
  0x4b   :  { %p1549_p6 = pnand %p1547_p5, %p1544_p4 }
  0x4d   :  { %1552 = shalt.err (!%p1549_p6)
}
  0x4e   :  { %s1553_s18 = scalar_lea.vmem %s81_s14, 2048  ;;  %p1558_p8 = scmp.lt.s32.totalorder %s81_s14, %s81_s14 }
  0x4f   :  { %p1554_p7 = scmp.ne.s32.totalorder %s81_s14, %s1553_s18  ;;  %p1559_p9 = scmp.lt.s32.totalorder %s1553_s18, %s1553_s18 }
  0x51   :  { %p1560_p10 = por %p1559_p9, %p1558_p8 }
  0x53   :  { %p1561_p11 = pnand %p1560_p10, %p1554_p7 }
  0x55   :  { %1564 = shalt.err (!%p1561_p11)
}
  0x56   :  { %86 = dma.hbm_to_vmem [thread:$0]  %s1872_s7, 2048, %s81_s14, [#allocation11], %s1626_s5, %s1626_s5, %s1627_s28  }
  0x57   :  { %1609 = dma.done.wait [#allocation5], 256  }
  0x58   :  { %1610 = vsyncadd [#allocation5], 4294967040 }
  0x59   :  { %1611 = dma.done.wait [#allocation8], 12288  }
  0x5a   :  { %1612 = vsyncadd [#allocation8], 4294955008 }
  0x5b   :  { %1613 = dma.done.wait [#allocation11], 18432  }
  0x5c   :  { %1614 = vsyncadd [#allocation11], 4294948864  ;;  %v1630_v0 = vmov 0   ;;  %v1631_v1 = vmov 0.0|0.0   ;;  %v104_v2 = vld [vmem:[%s1865_s0] sm:$0xff]  ;;  %v114_v3 = vld [vmem:[#allocation7 + $0x8] sm:$0xff] }
  0x5d   :  { %1434 = vset.pattern.permute.xlu0 %v1630_v0  ;;  %1180 = vmatprep.subr.bf16.mxu1 %v1631_v1  ;;  %v117_v4 = vld [vmem:[#allocation7 + $0x20] sm:$0xff]  ;;  %v116_v7 = vld [vmem:[#allocation7 + $0x18] sm:$0xff]  ;;  %v115_v8 = vld [vmem:[#allocation7 + $0x10] sm:$0xff]  ;;  %v1632_v9 = vmov 0.0   ;;  %vm1633_vm0 = vmmov 0  }
  0x5e   :  { %108 = vperm.xlu0 %1434, %v104_v2   ;;  %v1148_v5 = vpack.c.bf16 %v117_v4, %v114_v3  ;;  %v113_v6 = vld [vmem:[#allocation7] sm:$0xff]  ;;  %225 = vmatprep.mubr.f32.mxu0 %v1632_v9  ;;  %v118_v11 = vld [vmem:[#allocation7 + $0x28] sm:$0xff]  ;;  %v120_v12 = vld [vmem:[#allocation7 + $0x38] sm:$0xff] }
  0x5f   :  { %v1150_v10 = vpack.c.bf16 %v116_v7, %v113_v6  ;;  %v123_v13 = vld [vmem:[#allocation7 + $0x50] sm:$0xff]  ;;  %1075 = vmatprep.mubr.msk.f32.mxu1 %vm1633_vm0, %v1632_v9  ;;  %v1181_v14 = vpack.c.bf16 %v118_v11, %v115_v8  ;;  %v122_v17 = vld [vmem:[#allocation7 + $0x48] sm:$0xff]  ;;  %v121_v18 = vld [vmem:[#allocation7 + $0x40] sm:$0xff] }
  0x60   :  { %1149 = vmatprep.subr.bf16.mxu0 %v1148_v5  ;;  %v1152_v15 = vpack.c.bf16 %v123_v13, %v120_v12  ;;  %v119_v16 = vld [vmem:[#allocation7 + $0x30] sm:$0xff]  ;;  %v124_v20 = vld [vmem:[#allocation7 + $0x58] sm:$0xff]  ;;  %v126_v21 = vld [vmem:[#allocation7 + $0x68] sm:$0xff] }
  0x61   :  { %1151 = vmatpush1.bf16.msra.mxu0 %v1150_v10  ;;  %v1154_v19 = vpack.c.bf16 %v122_v17, %v119_v16  ;;  %v129_v22 = vld [vmem:[#allocation7 + $0x80] sm:$0xff]  ;;  %1182 = vmatpush3.bf16.msra.mxu1 %v1181_v14  ;;  %v1184_v23 = vpack.c.bf16 %v124_v20, %v121_v18  ;;  %v128_v26 = vld [vmem:[#allocation7 + $0x78] sm:$0xff]  ;;  %v127_v27 = vld [vmem:[#allocation7 + $0x70] sm:$0xff]  ;;  %v105_v17 = vlaneseq }
  0x62   :  { %1153 = vmatprep.subr.bf16.mxu0 %v1152_v15  ;;  %v1156_v24 = vpack.c.bf16 %v129_v22, %v126_v21  ;;  %v125_v25 = vld [vmem:[#allocation7 + $0x60] sm:$0xff]  ;;  %1183 = vmatprep.subr.bf16.mxu1 %v1631_v1  ;;  %v130_v28 = vld [vmem:[#allocation7 + $0x88] sm:$0xff]  ;;  %v132_v29 = vld [vmem:[#allocation7 + $0x98] sm:$0xff] }
  0x63   :  { %v135_v30 = vld [vmem:[#allocation7 + $0xb0] sm:$0xff]  ;;  %v1158_v31 = vpack.c.bf16 %v128_v26, %v125_v25  ;;  %v1187_v32 = vpack.c.bf16 %v130_v28, %v127_v27  ;;  %v134_v35 = vld [vmem:[#allocation7 + $0xa8] sm:$0xff]  ;;  %v133_v36 = vld [vmem:[#allocation7 + $0xa0] sm:$0xff]  ;;  %v106_v22 = vand.u32 127, %v105_v17 }
  0x64   :  { %v1160_v33 = vpack.c.bf16 %v135_v30, %v132_v29  ;;  %v131_v34 = vld [vmem:[#allocation7 + $0x90] sm:$0xff]  ;;  %v136_v37 = vld [vmem:[#allocation7 + $0xb8] sm:$0xff]  ;;  %v138_v38 = vld [vmem:[#allocation7 + $0xc8] sm:$0xff] }
  0x65   :  { %1155 = vmatpush1.bf16.msra.mxu0 %v1154_v19  ;;  %1185 = vmatpush3.bf16.msra.mxu1 %v1184_v23  ;;  %v141_v39 = vld [vmem:[#allocation7 + $0xe0] sm:$0xff]  ;;  %v1162_v40 = vpack.c.bf16 %v134_v35, %v131_v34  ;;  %v1190_v41 = vpack.c.bf16 %v136_v37, %v133_v36  ;;  %v140_v44 = vld [vmem:[#allocation7 + $0xd8] sm:$0xff]  ;;  %v139_v45 = vld [vmem:[#allocation7 + $0xd0] sm:$0xff]  ;;  %v1634_v35 = vmov 1.0  }
  0x66   :  { %1157 = vmatprep.subr.bf16.mxu0 %v1156_v24  ;;  %1186 = vmatprep.subr.bf16.mxu1 %v1631_v1  ;;  %v1164_v42 = vpack.c.bf16 %v141_v39, %v138_v38  ;;  %v137_v43 = vld [vmem:[#allocation7 + $0xc0] sm:$0xff]  ;;  %v142_v46 = vld [vmem:[#allocation7 + $0xe8] sm:$0xff]  ;;  %v144_v47 = vld [vmem:[#allocation7 + $0xf8] sm:$0xff] }
  0x67   :  { %v147_v48 = vld [vmem:[#allocation7 + $0x110] sm:$0xff]  ;;  %v1166_v49 = vpack.c.bf16 %v140_v44, %v137_v43  ;;  %v1193_v50 = vpack.c.bf16 %v142_v46, %v139_v45  ;;  %v146_v53 = vld [vmem:[#allocation7 + $0x108] sm:$0xff]  ;;  %v145_v54 = vld [vmem:[#allocation7 + $0x100] sm:$0xff] }
  0x68   :  { %v1168_v51 = vpack.c.bf16 %v147_v48, %v144_v47  ;;  %v143_v52 = vld [vmem:[#allocation7 + $0xf0] sm:$0xff]  ;;  %v148_v55 = vld [vmem:[#allocation7 + $0x118] sm:$0xff]  ;;  %v150_v56 = vld [vmem:[#allocation7 + $0x128] sm:$0xff] }
  0x69   :  { %1159 = vmatpush1.bf16.msra.mxu0 %v1158_v31  ;;  %1188 = vmatpush3.bf16.msra.mxu1 %v1187_v32  ;;  %v153_v57 = vld [vmem:[#allocation7 + $0x140] sm:$0xff]  ;;  %v1170_v58 = vpack.c.bf16 %v146_v53, %v143_v52  ;;  %v1196_v59 = vpack.c.bf16 %v148_v55, %v145_v54  ;;  %v152_v62 = vld [vmem:[#allocation7 + $0x138] sm:$0xff]  ;;  %v151_v63 = vld [vmem:[#allocation7 + $0x130] sm:$0xff] }
  0x6a   :  { %1161 = vmatprep.subr.bf16.mxu0 %v1160_v33  ;;  %1189 = vmatprep.subr.bf16.mxu1 %v1631_v1  ;;  %v1172_v60 = vpack.c.bf16 %v153_v57, %v150_v56  ;;  %v149_v61 = vld [vmem:[#allocation7 + $0x120] sm:$0xff]  ;;  %v154_v0 = vld [vmem:[#allocation7 + $0x148] sm:$0xff]  ;;  %v156_v2 = vld [vmem:[#allocation7 + $0x158] sm:$0xff] }
  0x6b   :  { %v159_v3 = vld [vmem:[#allocation7 + $0x170] sm:$0xff]  ;;  %v1174_v4 = vpack.c.bf16 %v152_v62, %v149_v61  ;;  %v1199_v5 = vpack.c.bf16 %v154_v0, %v151_v63  ;;  %v158_v8 = vld [vmem:[#allocation7 + $0x168] sm:$0xff]  ;;  %v157_v10 = vld [vmem:[#allocation7 + $0x160] sm:$0xff] }
  0x6c   :  { %v1176_v6 = vpack.c.bf16 %v159_v3, %v156_v2  ;;  %v155_v7 = vld [vmem:[#allocation7 + $0x150] sm:$0xff]  ;;  %v160_v11 = vld [vmem:[#allocation7 + $0x178] sm:$0xff]  ;;  %v315_v12 = vld [vmem:[#allocation9 + $0x8] sm:$0xff] }
  0x6d   :  { %1163 = vmatpush1.bf16.msra.mxu0 %v1162_v40  ;;  %1191 = vmatpush3.bf16.msra.mxu1 %v1190_v41  ;;  %v318_v13 = vld [vmem:[#allocation9 + $0x20] sm:$0xff]  ;;  %v1178_v14 = vpack.c.bf16 %v158_v8, %v155_v7  ;;  %v1202_v15 = vpack.c.bf16 %v160_v11, %v157_v10  ;;  %v317_v19 = vld [vmem:[#allocation9 + $0x18] sm:$0xff]  ;;  %v316_v20 = vld [vmem:[#allocation9 + $0x10] sm:$0xff] }
  0x6e   :  { %1165 = vmatprep.subr.bf16.mxu0 %v1164_v42  ;;  %1192 = vmatprep.subr.bf16.mxu1 %v1631_v1  ;;  %v1204_v16 = vpack.c.bf16 %v318_v13, %v315_v12  ;;  %v314_v18 = vld [vmem:[#allocation9] sm:$0xff]  ;;  %v319_v21 = vld [vmem:[#allocation9 + $0x28] sm:$0xff]  ;;  %v321_v23 = vld [vmem:[#allocation9 + $0x38] sm:$0xff] }
  0x6f   :  { %v324_v24 = vld [vmem:[#allocation9 + $0x50] sm:$0xff]  ;;  %v1206_v25 = vpack.c.bf16 %v317_v19, %v314_v18  ;;  %v1237_v27 = vpack.c.bf16 %v319_v21, %v316_v20  ;;  %v323_v30 = vld [vmem:[#allocation9 + $0x48] sm:$0xff]  ;;  %v322_v31 = vld [vmem:[#allocation9 + $0x40] sm:$0xff] }
  0x70   :  { %v320_v26 = vld [vmem:[#allocation9 + $0x30] sm:$0xff]  ;;  %v1208_v29 = vpack.c.bf16 %v324_v24, %v321_v23  ;;  %v325_v32 = vld [vmem:[#allocation9 + $0x58] sm:$0xff]  ;;  %v327_v33 = vld [vmem:[#allocation9 + $0x68] sm:$0xff] }
  0x71   :  { %1167 = vmatpush1.bf16.msra.mxu0 %v1166_v49  ;;  %1194 = vmatpush3.bf16.msra.mxu1 %v1193_v50  ;;  %v330_v34 = vld [vmem:[#allocation9 + $0x80] sm:$0xff]  ;;  %v1210_v36 = vpack.c.bf16 %v323_v30, %v320_v26  ;;  %v1240_v38 = vpack.c.bf16 %v325_v32, %v322_v31  ;;  %v329_v40 = vld [vmem:[#allocation9 + $0x78] sm:$0xff]  ;;  %v328_v41 = vld [vmem:[#allocation9 + $0x70] sm:$0xff] }
  0x72   :  { %1169 = vmatprep.subr.bf16.mxu0 %v1168_v51  ;;  %1195 = vmatprep.subr.bf16.mxu1 %v1631_v1  ;;  %v326_v37 = vld [vmem:[#allocation9 + $0x60] sm:$0xff]  ;;  %v1212_v39 = vpack.c.bf16 %v330_v34, %v327_v33  ;;  %v331_v42 = vld [vmem:[#allocation9 + $0x88] sm:$0xff]  ;;  %v333_v43 = vld [vmem:[#allocation9 + $0x98] sm:$0xff] }
  0x73   :  { %v336_v44 = vld [vmem:[#allocation9 + $0xb0] sm:$0xff]  ;;  %v1214_v45 = vpack.c.bf16 %v329_v40, %v326_v37  ;;  %v1243_v47 = vpack.c.bf16 %v331_v42, %v328_v41  ;;  %v335_v49 = vld [vmem:[#allocation9 + $0xa8] sm:$0xff]  ;;  %v334_v50 = vld [vmem:[#allocation9 + $0xa0] sm:$0xff] }
  0x74   :  { %v332_v46 = vld [vmem:[#allocation9 + $0x90] sm:$0xff]  ;;  %v1216_v48 = vpack.c.bf16 %v336_v44, %v333_v43  ;;  %v337_v51 = vld [vmem:[#allocation9 + $0xb8] sm:$0xff]  ;;  %v339_v52 = vld [vmem:[#allocation9 + $0xc8] sm:$0xff] }
  0x75   :  { %1171 = vmatpush1.bf16.msra.mxu0 %v1170_v58  ;;  %1197 = vmatpush3.bf16.msra.mxu1 %v1196_v59  ;;  %v342_v53 = vld [vmem:[#allocation9 + $0xe0] sm:$0xff]  ;;  %v1218_v54 = vpack.c.bf16 %v335_v49, %v332_v46  ;;  %v1246_v56 = vpack.c.bf16 %v337_v51, %v334_v50  ;;  %v341_v58 = vld [vmem:[#allocation9 + $0xd8] sm:$0xff]  ;;  %v340_v59 = vld [vmem:[#allocation9 + $0xd0] sm:$0xff] }
  0x76   :  { %1173 = vmatprep.subr.bf16.mxu0 %v1172_v60  ;;  %1198 = vmatprep.subr.bf16.mxu1 %v1631_v1  ;;  %v338_v55 = vld [vmem:[#allocation9 + $0xc0] sm:$0xff]  ;;  %v1220_v57 = vpack.c.bf16 %v342_v53, %v339_v52  ;;  %v343_v60 = vld [vmem:[#allocation9 + $0xe8] sm:$0xff]  ;;  %v345_v61 = vld [vmem:[#allocation9 + $0xf8] sm:$0xff] }
  0x77   :  { %v348_v62 = vld [vmem:[#allocation9 + $0x110] sm:$0xff]  ;;  %v1222_v63 = vpack.c.bf16 %v341_v58, %v338_v55  ;;  %v1249_v2 = vpack.c.bf16 %v343_v60, %v340_v59  ;;  %v351_v7 = vld [vmem:[#allocation9 + $0x128] sm:$0xff]  ;;  %v354_v8 = vld [vmem:[#allocation9 + $0x140] sm:$0xff] }
  0x78   :  { %v344_v0 = vld [vmem:[#allocation9 + $0xf0] sm:$0xff]  ;;  %v1224_v3 = vpack.c.bf16 %v348_v62, %v345_v61  ;;  %v350_v11 = vld [vmem:[#allocation9 + $0x120] sm:$0xff]  ;;  %v1228_v13 = vpack.c.bf16 %v354_v8, %v351_v7  ;;  %v357_v18 = vld [vmem:[#allocation9 + $0x158] sm:$0xff] }
  0x79   :  { %1175 = vmatpush1.bf16.msra.mxu0 %v1174_v4  ;;  %1200 = vmatpush3.bf16.msra.mxu1 %v1199_v5  ;;  %v347_v4 = vld [vmem:[#allocation9 + $0x108] sm:$0xff]  ;;  %v346_v5 = vld [vmem:[#allocation9 + $0x100] sm:$0xff]  ;;  %v360_v19 = vld [vmem:[#allocation9 + $0x170] sm:$0xff] }
  0x7a   :  { %1177 = vmatprep.subr.bf16.mxu0 %v1176_v6  ;;  %1201 = vmatprep.subr.bf16.mxu1 %v1631_v1  ;;  %v349_v6 = vld [vmem:[#allocation9 + $0x118] sm:$0xff]  ;;  %v1226_v10 = vpack.c.bf16 %v347_v4, %v344_v0  ;;  %v356_v21 = vld [vmem:[#allocation9 + $0x150] sm:$0xff]  ;;  %v1232_v23 = vpack.c.bf16 %v360_v19, %v357_v18  ;;  %v359_v24 = vld [vmem:[#allocation9 + $0x168] sm:$0xff] }
  0x7b   :  { %v1252_v12 = vpack.c.bf16 %v349_v6, %v346_v5  ;;  %v361_v26 = vld [vmem:[#allocation9 + $0x178] sm:$0xff]  ;;  %v542_v30 = vld [vmem:[#allocation10 + $0x8] sm:$0xff]  ;;  %v547_v40 = vld [vmem:[#allocation10 + $0x30] sm:$0xff] }
  0x7c   :  { %v546_v31 = vld [vmem:[#allocation10 + $0x28] sm:$0xff]  ;;  %v544_v32 = vld [vmem:[#allocation10 + $0x18] sm:$0xff]  ;;  %v553_v49 = vld [vmem:[#allocation10 + $0x60] sm:$0xff] }
  0x7d   :  { %1179 = vmatpush1.bf16.msra.mxu0 %v1178_v14  ;;  %1203 = vmatpush3.bf16.msra.mxu1 %v1202_v15  ;;  %v353_v14 = vld [vmem:[#allocation9 + $0x138] sm:$0xff]  ;;  %v352_v15 = vld [vmem:[#allocation9 + $0x130] sm:$0xff]  ;;  %v1260_v33 = vpack.c.bf16 %v546_v31, %v542_v30  ;;  %v550_v41 = vld [vmem:[#allocation10 + $0x48] sm:$0xff] }
  0x7e   :  { %1205 = vmatprep.subr.bf16.mxu0 %v1204_v16  ;;  %1236 = vmatprep.subr.bf16.mxu1 %v1631_v1  ;;  %v355_v16 = vld [vmem:[#allocation9 + $0x148] sm:$0xff]  ;;  %v1230_v20 = vpack.c.bf16 %v353_v14, %v350_v11  ;;  %v548_v34 = vld [vmem:[#allocation10 + $0x38] sm:$0xff]  ;;  %v551_v50 = vld [vmem:[#allocation10 + $0x50] sm:$0xff] }
  0x7f   :  { %v1324_v37 = vpack.c.bf16 %v548_v34, %v544_v32  ;;  %v554_v43 = vld [vmem:[#allocation10 + $0x68] sm:$0xff]  ;;  %v552_v44 = vld [vmem:[#allocation10 + $0x58] sm:$0xff]  ;;  %v555_v52 = vld [vmem:[#allocation10 + $0x70] sm:$0xff] }
  0x80   :  { %v1264_v46 = vpack.c.bf16 %v554_v43, %v550_v41  ;;  %v558_v53 = vld [vmem:[#allocation10 + $0x88] sm:$0xff]  ;;  %v1330_v55 = vpack.c.bf16 %v555_v52, %v551_v50  ;;  %v564_v58 = vld [vmem:[#allocation10 + $0xb8] sm:$0xff]  ;;  %v557_v59 = vld [vmem:[#allocation10 + $0x80] sm:$0xff] }
  0x81   :  { %v561_v61 = vld [vmem:[#allocation10 + $0xa0] sm:$0xff]  ;;  %v559_v62 = vld [vmem:[#allocation10 + $0x90] sm:$0xff]  ;;  %v568_v4 = vld [vmem:[#allocation10 + $0xd8] sm:$0xff] }
  0x82   :  { %v1270_v0 = vpack.c.bf16 %v561_v61, %v557_v59  ;;  %v572_v7 = vld [vmem:[#allocation10 + $0xf8] sm:$0xff]  ;;  %v565_v8 = vld [vmem:[#allocation10 + $0xc0] sm:$0xff]  ;;  %v578_v18 = vld [vmem:[#allocation10 + $0x128] sm:$0xff] }
  0x83   :  { %v1336_v11 = vpack.c.bf16 %v572_v7, %v568_v4  ;;  %v576_v19 = vld [vmem:[#allocation10 + $0x118] sm:$0xff]  ;;  %v582_v30 = vld [vmem:[#allocation10 + $0x148] sm:$0xff]  ;;  %v595_v52 = vld [vmem:[#allocation10 + $0x1b0] sm:$0xff] }
  0x84   :  { %v586_v31 = vld [vmem:[#allocation10 + $0x168] sm:$0xff]  ;;  %v584_v32 = vld [vmem:[#allocation10 + $0x158] sm:$0xff]  ;;  %v597_v59 = vld [vmem:[#allocation10 + $0x1c0] sm:$0xff] }
  0x85   :  { %v588_v34 = vld [vmem:[#allocation10 + $0x178] sm:$0xff]  ;;  %v594_v43 = vld [vmem:[#allocation10 + $0x1a8] sm:$0xff] }
  0x86   :  { %v610_v4 = vld [vmem:[#allocation10 + $0x228] sm:$0xff]  ;;  %v612_v7 = vld [vmem:[#allocation10 + $0x238] sm:$0xff] }
  0xdd   :  { %v109_v28 = vpop.permute.xlu0 %108 }
  0xde   :  { %vm110_vm1 = vcmp.eq.s32.totalorder %v109_v28, %v106_v22  ;;  %v1255_v22 = vpack.c.bf16 %v355_v16, %v352_v15  ;;  %v574_v16 = vld [vmem:[#allocation10 + $0x108] sm:$0xff] }
  0xdf   :  { %985 = vmatmul.mubr.msk.f32.vlgmr.msra.gmra.mrb[0].mxu0 %vm110_vm1, %v1634_v35  ;;  %1076 = vmatmul.mubr.msk.f32.vlgmr.msra.gmra.mrb[0].mxu1 %vm110_vm1, %v1634_v35  ;;  %v541_v35 = vld [vmem:[#allocation10] sm:$0xff] }
  0xe0   :  { %1207 = vmatpush1.bf16.msra.mxu0 %v1206_v25  ;;  %1238 = vmatpush3.bf16.msra.mxu1 %v1237_v27  ;;  %v358_v25 = vld [vmem:[#allocation9 + $0x160] sm:$0xff]  ;;  %v1234_v27 = vpack.c.bf16 %v359_v24, %v356_v21  ;;  %v580_v21 = vld [vmem:[#allocation10 + $0x138] sm:$0xff] }
  0xe1   :  { %1209 = vmatprep.subr.bf16.mxu0 %v1208_v29  ;;  %1239 = vmatprep.subr.bf16.mxu1 %v1631_v1  ;;  %v1258_v28 = vpack.c.bf16 %v361_v26, %v358_v25  ;;  %v1790_v29 = vld [vmem:[#allocation4] sm:$0xff]  ;;  %v1340_v24 = vpack.c.bf16 %v580_v21, %v576_v19  ;;  %v616_v19 = vld [vmem:[#allocation10 + $0x258] sm:$0xff] }
  0xe2   :  { %443 = vmatprep.mubr.f32.mxu0 %v1632_v9  ;;  %1110 = vmatprep.mubr.msk.f32.mxu1 %vm1633_vm0, %v1632_v9  ;;  %v575_v26 = vld [vmem:[#allocation10 + $0x110] sm:$0xff]  ;;  %v620_v21 = vld [vmem:[#allocation10 + $0x278] sm:$0xff] }
  0xe4   :  { %1211 = vmatpush1.bf16.msra.mxu0 %v1210_v36  ;;  %1241 = vmatpush3.bf16.msra.mxu1 %v1240_v38  ;;  %v545_v36 = vld [vmem:[#allocation10 + $0x20] sm:$0xff] }
  0xe5   :  { %1213 = vmatprep.subr.bf16.mxu0 %v1212_v39  ;;  %1242 = vmatprep.subr.bf16.mxu1 %v1631_v1  ;;  %v1262_v38 = vpack.c.bf16 %v545_v36, %v541_v35  ;;  %v543_v39 = vld [vmem:[#allocation10 + $0x10] sm:$0xff]  ;;  %v581_v35 = vld [vmem:[#allocation10 + $0x140] sm:$0xff] }
  0xe6   :  { %v1326_v42 = vpack.c.bf16 %v547_v40, %v543_v39  ;;  %v585_v36 = vld [vmem:[#allocation10 + $0x160] sm:$0xff]  ;;  %v583_v39 = vld [vmem:[#allocation10 + $0x150] sm:$0xff] }
  0xe7   :  { %v587_v40 = vld [vmem:[#allocation10 + $0x170] sm:$0xff] }
  0xe8   :  { %1215 = vmatpush1.bf16.msra.mxu0 %v1214_v45  ;;  %1244 = vmatpush3.bf16.msra.mxu1 %v1243_v47  ;;  %v556_v45 = vld [vmem:[#allocation10 + $0x78] sm:$0xff]  ;;  %v1346_v41 = vpack.c.bf16 %v587_v40, %v583_v39  ;;  %v627_v40 = vld [vmem:[#allocation10 + $0x2b0] sm:$0xff] }
  0xe9   :  { %1217 = vmatprep.subr.bf16.mxu0 %v1216_v48  ;;  %1245 = vmatprep.subr.bf16.mxu1 %v1631_v1  ;;  %v1328_v47 = vpack.c.bf16 %v556_v45, %v552_v44  ;;  %v549_v48 = vld [vmem:[#allocation10 + $0x40] sm:$0xff]  ;;  %v592_v44 = vld [vmem:[#allocation10 + $0x198] sm:$0xff] }
  0xea   :  { %v1266_v51 = vpack.c.bf16 %v553_v49, %v549_v48  ;;  %v593_v48 = vld [vmem:[#allocation10 + $0x1a0] sm:$0xff] }
  0xec   :  { %1219 = vmatpush1.bf16.msra.mxu0 %v1218_v54  ;;  %1247 = vmatpush3.bf16.msra.mxu1 %v1246_v56  ;;  %v562_v54 = vld [vmem:[#allocation10 + $0xa8] sm:$0xff] }
  0xed   :  { %1221 = vmatprep.subr.bf16.mxu0 %v1220_v57  ;;  %1248 = vmatprep.subr.bf16.mxu1 %v1631_v1  ;;  %v1268_v56 = vpack.c.bf16 %v562_v54, %v558_v53  ;;  %v560_v57 = vld [vmem:[#allocation10 + $0x98] sm:$0xff]  ;;  %v598_v54 = vld [vmem:[#allocation10 + $0x1c8] sm:$0xff] }
  0xee   :  { %v1332_v60 = vpack.c.bf16 %v564_v58, %v560_v57  ;;  %v604_v58 = vld [vmem:[#allocation10 + $0x1f8] sm:$0xff] }
  0xf0   :  { %1223 = vmatpush1.bf16.msra.mxu0 %v1222_v63  ;;  %1250 = vmatpush3.bf16.msra.mxu1 %v1249_v2  ;;  %v563_v63 = vld [vmem:[#allocation10 + $0xb0] sm:$0xff]  ;;  %v566_v2 = vld [vmem:[#allocation10 + $0xc8] sm:$0xff] }
  0xf1   :  { %1225 = vmatprep.subr.bf16.mxu0 %v1224_v3  ;;  %1251 = vmatprep.subr.bf16.mxu1 %v1631_v1  ;;  %v570_v3 = vld [vmem:[#allocation10 + $0xe8] sm:$0xff]  ;;  %v1334_v5 = vpack.c.bf16 %v563_v63, %v559_v62  ;;  %v599_v63 = vld [vmem:[#allocation10 + $0x1d0] sm:$0xff] }
  0xf2   :  { %v1272_v6 = vpack.c.bf16 %v570_v3, %v566_v2  ;;  %v606_v3 = vld [vmem:[#allocation10 + $0x208] sm:$0xff] }
  0xf4   :  { %1227 = vmatpush1.bf16.msra.mxu0 %v1226_v10  ;;  %1253 = vmatpush3.bf16.msra.mxu1 %v1252_v12  ;;  %v569_v10 = vld [vmem:[#allocation10 + $0xe0] sm:$0xff]  ;;  %v567_v12 = vld [vmem:[#allocation10 + $0xd0] sm:$0xff] }
  0xf5   :  { %1229 = vmatprep.subr.bf16.mxu0 %v1228_v13  ;;  %1254 = vmatprep.subr.bf16.mxu1 %v1631_v1  ;;  %v571_v13 = vld [vmem:[#allocation10 + $0xf0] sm:$0xff]  ;;  %v1274_v14 = vpack.c.bf16 %v569_v10, %v565_v8  ;;  %v605_v8 = vld [vmem:[#allocation10 + $0x200] sm:$0xff] }
  0xf6   :  { %v1338_v15 = vpack.c.bf16 %v571_v13, %v567_v12  ;;  %v609_v10 = vld [vmem:[#allocation10 + $0x220] sm:$0xff]  ;;  %v607_v13 = vld [vmem:[#allocation10 + $0x210] sm:$0xff] }
  0xf7   :  { %v1294_v12 = vpack.c.bf16 %v609_v10, %v605_v8  ;;  %v645_v8 = vld [vmem:[#allocation10 + $0x340] sm:$0xff] }
  0xf8   :  { %1231 = vmatpush1.bf16.msra.mxu0 %v1230_v20  ;;  %1256 = vmatpush3.bf16.msra.mxu1 %v1255_v22  ;;  %v1276_v20 = vpack.c.bf16 %v578_v18, %v574_v16  ;;  %v573_v22 = vld [vmem:[#allocation10 + $0x100] sm:$0xff]  ;;  %v614_v16 = vld [vmem:[#allocation10 + $0x248] sm:$0xff] }
  0xf9   :  { %1233 = vmatprep.subr.bf16.mxu0 %v1232_v23  ;;  %1257 = vmatprep.subr.bf16.mxu1 %v1631_v1  ;;  %v577_v23 = vld [vmem:[#allocation10 + $0x120] sm:$0xff]  ;;  %v618_v18 = vld [vmem:[#allocation10 + $0x268] sm:$0xff] }
  0xfa   :  { %v1278_v25 = vpack.c.bf16 %v577_v23, %v573_v22  ;;  %v613_v22 = vld [vmem:[#allocation10 + $0x240] sm:$0xff] }
  0xfb   :  { %v617_v23 = vld [vmem:[#allocation10 + $0x260] sm:$0xff] }
  0xfc   :  { %1235 = vmatpush1.bf16.msra.mxu0 %v1234_v27  ;;  %1259 = vmatpush3.bf16.msra.mxu1 %v1258_v28  ;;  %v579_v27 = vld [vmem:[#allocation10 + $0x130] sm:$0xff]  ;;  %v649_v10 = vld [vmem:[#allocation10 + $0x360] sm:$0xff] }
  0xfd   :  { %1261 = vmatprep.subr.bf16.mxu0 %v1260_v33  ;;  %1325 = vmatprep.subr.bf16.mxu1 %v1324_v37  ;;  %v1342_v28 = vpack.c.bf16 %v579_v27, %v575_v26  ;;  %v1280_v33 = vpack.c.bf16 %v586_v31, %v582_v30  ;;  %v1344_v37 = vpack.c.bf16 %v588_v34, %v584_v32  ;;  %v615_v26 = vld [vmem:[#allocation10 + $0x250] sm:$0xff]  ;;  %v626_v31 = vld [vmem:[#allocation10 + $0x2a8] sm:$0xff]  ;;  %v624_v32 = vld [vmem:[#allocation10 + $0x298] sm:$0xff] }
  0xfe   :  { %v619_v27 = vld [vmem:[#allocation10 + $0x270] sm:$0xff] }
  0xff   :  { %444 = vmatmul.mubr.f32.vlgmr.msra.gmra.mrb[0].mxu0 %v1790_v29  ;;  %1111 = vmatmul.mubr.f32.vlgmr.msra.gmra.mrb[2].mxu1 %v1790_v29  ;;  %v1362_v30 = vpack.c.bf16 %v619_v27, %v615_v26  ;;  %v659_v27 = vld [vmem:[#allocation10 + $0x3b0] sm:$0xff] }
 0x100   :  { %1263 = vmatpush1.bf16.msra.mxu0 %v1262_v38  ;;  %1327 = vmatpush1.bf16.msra.mxu1 %v1326_v42  ;;  %v1282_v38 = vpack.c.bf16 %v585_v36, %v581_v35  ;;  %v590_v42 = vld [vmem:[#allocation10 + $0x188] sm:$0xff]  ;;  %v621_v36 = vld [vmem:[#allocation10 + $0x280] sm:$0xff] }
 0x101   :  { %1265 = vmatprep.subr.bf16.mxu0 %v1264_v46  ;;  %1329 = vmatprep.subr.bf16.mxu1 %v1328_v47  ;;  %v1284_v45 = vpack.c.bf16 %v594_v43, %v590_v42  ;;  %v596_v46 = vld [vmem:[#allocation10 + $0x1b8] sm:$0xff]  ;;  %v589_v47 = vld [vmem:[#allocation10 + $0x180] sm:$0xff]  ;;  %v630_v42 = vld [vmem:[#allocation10 + $0x2c8] sm:$0xff] }
 0x102   :  { %v1348_v49 = vpack.c.bf16 %v596_v46, %v592_v44  ;;  %v1286_v50 = vpack.c.bf16 %v593_v48, %v589_v47  ;;  %v634_v43 = vld [vmem:[#allocation10 + $0x2e8] sm:$0xff]  ;;  %v632_v44 = vld [vmem:[#allocation10 + $0x2d8] sm:$0xff]  ;;  %v629_v47 = vld [vmem:[#allocation10 + $0x2c0] sm:$0xff] }
 0x103   :  { %v636_v46 = vld [vmem:[#allocation10 + $0x2f8] sm:$0xff]  ;;  %v633_v48 = vld [vmem:[#allocation10 + $0x2e0] sm:$0xff] }
 0x104   :  { %1267 = vmatpush1.bf16.msra.mxu0 %v1266_v51  ;;  %1331 = vmatpush1.bf16.msra.mxu1 %v1330_v55  ;;  %v591_v51 = vld [vmem:[#allocation10 + $0x190] sm:$0xff]  ;;  %v602_v55 = vld [vmem:[#allocation10 + $0x1e8] sm:$0xff] }
 0x105   :  { %1269 = vmatprep.subr.bf16.mxu0 %v1268_v56  ;;  %1333 = vmatprep.subr.bf16.mxu1 %v1332_v60  ;;  %v1350_v53 = vpack.c.bf16 %v595_v52, %v591_v51  ;;  %v600_v56 = vld [vmem:[#allocation10 + $0x1d8] sm:$0xff]  ;;  %v1288_v57 = vpack.c.bf16 %v602_v55, %v598_v54  ;;  %v601_v60 = vld [vmem:[#allocation10 + $0x1e0] sm:$0xff]  ;;  %v631_v51 = vld [vmem:[#allocation10 + $0x2d0] sm:$0xff] }
 0x106   :  { %v1352_v61 = vpack.c.bf16 %v604_v58, %v600_v56  ;;  %v1290_v62 = vpack.c.bf16 %v601_v60, %v597_v59  ;;  %v635_v52 = vld [vmem:[#allocation10 + $0x2f0] sm:$0xff]  ;;  %v638_v54 = vld [vmem:[#allocation10 + $0x308] sm:$0xff]  ;;  %v640_v56 = vld [vmem:[#allocation10 + $0x318] sm:$0xff] }
 0x107   :  { %v642_v55 = vld [vmem:[#allocation10 + $0x328] sm:$0xff]  ;;  %v644_v58 = vld [vmem:[#allocation10 + $0x338] sm:$0xff]  ;;  %v637_v59 = vld [vmem:[#allocation10 + $0x300] sm:$0xff] }
 0x108   :  { %1271 = vmatpush1.bf16.msra.mxu0 %v1270_v0  ;;  %1335 = vmatpush1.bf16.msra.mxu1 %v1334_v5  ;;  %v603_v0 = vld [vmem:[#allocation10 + $0x1f0] sm:$0xff]  ;;  %v608_v5 = vld [vmem:[#allocation10 + $0x218] sm:$0xff]  ;;  %v641_v60 = vld [vmem:[#allocation10 + $0x320] sm:$0xff] }
 0x109   :  { %1273 = vmatprep.subr.bf16.mxu0 %v1272_v6  ;;  %1337 = vmatprep.subr.bf16.mxu1 %v1336_v11  ;;  %v1354_v2 = vpack.c.bf16 %v603_v0, %v599_v63  ;;  %v1292_v6 = vpack.c.bf16 %v610_v4, %v606_v3  ;;  %v1356_v11 = vpack.c.bf16 %v612_v7, %v608_v5  ;;  %v639_v63 = vld [vmem:[#allocation10 + $0x310] sm:$0xff]  ;;  %v646_v3 = vld [vmem:[#allocation10 + $0x348] sm:$0xff]  ;;  %v648_v5 = vld [vmem:[#allocation10 + $0x358] sm:$0xff] }
 0x10a   :  { %v643_v0 = vld [vmem:[#allocation10 + $0x330] sm:$0xff]  ;;  %v650_v4 = vld [vmem:[#allocation10 + $0x368] sm:$0xff]  ;;  %v652_v7 = vld [vmem:[#allocation10 + $0x378] sm:$0xff] }
 0x10c   :  { %1275 = vmatpush1.bf16.msra.mxu0 %v1274_v14  ;;  %1339 = vmatpush1.bf16.msra.mxu1 %v1338_v15  ;;  %v611_v14 = vld [vmem:[#allocation10 + $0x230] sm:$0xff] }
 0x10d   :  { %1277 = vmatprep.subr.bf16.mxu0 %v1276_v20  ;;  %1341 = vmatprep.subr.bf16.mxu1 %v1340_v24  ;;  %v1358_v15 = vpack.c.bf16 %v611_v14, %v607_v13  ;;  %v1296_v20 = vpack.c.bf16 %v618_v18, %v614_v16  ;;  %v1360_v24 = vpack.c.bf16 %v620_v21, %v616_v19  ;;  %v647_v13 = vld [vmem:[#allocation10 + $0x350] sm:$0xff]  ;;  %v658_v18 = vld [vmem:[#allocation10 + $0x3a8] sm:$0xff]  ;;  %v656_v19 = vld [vmem:[#allocation10 + $0x398] sm:$0xff] }
 0x10e   :  { %v651_v14 = vld [vmem:[#allocation10 + $0x370] sm:$0xff] }
 0x10f   :  { %v1378_v16 = vpack.c.bf16 %v651_v14, %v647_v13  ;;  %v858_v13 = vld [vmem:[#allocation12 + $0x8] sm:$0xff] }
 0x110   :  { %1279 = vmatpush1.bf16.msra.mxu0 %v1278_v25  ;;  %1343 = vmatpush1.bf16.msra.mxu1 %v1342_v28  ;;  %v1298_v25 = vpack.c.bf16 %v617_v23, %v613_v22  ;;  %v622_v28 = vld [vmem:[#allocation10 + $0x288] sm:$0xff]  ;;  %v653_v23 = vld [vmem:[#allocation10 + $0x380] sm:$0xff] }
 0x111   :  { %1281 = vmatprep.subr.bf16.mxu0 %v1280_v33  ;;  %1345 = vmatprep.subr.bf16.mxu1 %v1344_v37  ;;  %v628_v33 = vld [vmem:[#allocation10 + $0x2b8] sm:$0xff]  ;;  %v1300_v34 = vpack.c.bf16 %v626_v31, %v622_v28  ;;  %v625_v37 = vld [vmem:[#allocation10 + $0x2a0] sm:$0xff]  ;;  %v662_v28 = vld [vmem:[#allocation10 + $0x3c8] sm:$0xff] }
 0x112   :  { %v1364_v35 = vpack.c.bf16 %v628_v33, %v624_v32  ;;  %v1302_v39 = vpack.c.bf16 %v625_v37, %v621_v36  ;;  %v664_v33 = vld [vmem:[#allocation10 + $0x3d8] sm:$0xff]  ;;  %v665_v37 = vld [vmem:[#allocation10 + $0x3e0] sm:$0xff] }
 0x114   :  { %1283 = vmatpush1.bf16.msra.mxu0 %v1282_v38  ;;  %1347 = vmatpush1.bf16.msra.mxu1 %v1346_v41  ;;  %v623_v38 = vld [vmem:[#allocation10 + $0x290] sm:$0xff] }
 0x115   :  { %1285 = vmatprep.subr.bf16.mxu0 %v1284_v45  ;;  %1349 = vmatprep.subr.bf16.mxu1 %v1348_v49  ;;  %v1366_v41 = vpack.c.bf16 %v627_v40, %v623_v38  ;;  %v1304_v45 = vpack.c.bf16 %v634_v43, %v630_v42  ;;  %v1368_v49 = vpack.c.bf16 %v636_v46, %v632_v44  ;;  %v663_v38 = vld [vmem:[#allocation10 + $0x3d0] sm:$0xff] }
 0x118   :  { %1287 = vmatpush1.bf16.msra.mxu0 %v1286_v50  ;;  %1351 = vmatpush1.bf16.msra.mxu1 %v1350_v53  ;;  %v1306_v50 = vpack.c.bf16 %v633_v48, %v629_v47  ;;  %v1370_v53 = vpack.c.bf16 %v635_v52, %v631_v51  ;;  %v362_v47 = vld [vmem:[%s1869_s4] sm:$0x7] }
 0x119   :  { %1289 = vmatprep.subr.bf16.mxu0 %v1288_v57  ;;  %1353 = vmatprep.subr.bf16.mxu1 %v1352_v61  ;;  %v1308_v57 = vpack.c.bf16 %v642_v55, %v638_v54  ;;  %v1372_v61 = vpack.c.bf16 %v644_v58, %v640_v56 }
 0x11c   :  { %1291 = vmatpush1.bf16.msra.mxu0 %v1290_v62  ;;  %1355 = vmatpush1.bf16.msra.mxu1 %v1354_v2  ;;  %v1310_v62 = vpack.c.bf16 %v641_v60, %v637_v59  ;;  %v1374_v2 = vpack.c.bf16 %v643_v0, %v639_v63 }
 0x11d   :  { %1293 = vmatprep.subr.bf16.mxu0 %v1292_v6  ;;  %1357 = vmatprep.subr.bf16.mxu1 %v1356_v11  ;;  %v1312_v6 = vpack.c.bf16 %v650_v4, %v646_v3  ;;  %v1376_v11 = vpack.c.bf16 %v652_v7, %v648_v5 }
 0x120   :  { %1295 = vmatpush1.bf16.msra.mxu0 %v1294_v12  ;;  %1359 = vmatpush1.bf16.msra.mxu1 %v1358_v15  ;;  %v1314_v12 = vpack.c.bf16 %v649_v10, %v645_v8  ;;  %v654_v15 = vld [vmem:[#allocation10 + $0x388] sm:$0xff] }
 0x121   :  { %1297 = vmatprep.subr.bf16.mxu0 %v1296_v20  ;;  %1361 = vmatprep.subr.bf16.mxu1 %v1360_v24  ;;  %v660_v20 = vld [vmem:[#allocation10 + $0x3b8] sm:$0xff]  ;;  %v1316_v21 = vpack.c.bf16 %v658_v18, %v654_v15  ;;  %v657_v24 = vld [vmem:[#allocation10 + $0x3a0] sm:$0xff]  ;;  %v859_v15 = vld [vmem:[#allocation12 + $0x10] sm:$0xff] }
 0x122   :  { %v1380_v22 = vpack.c.bf16 %v660_v20, %v656_v19  ;;  %v1318_v26 = vpack.c.bf16 %v657_v24, %v653_v23  ;;  %v862_v19 = vld [vmem:[#allocation12 + $0x28] sm:$0xff]  ;;  %v865_v23 = vld [vmem:[#allocation12 + $0x40] sm:$0xff] }
 0x123   :  { %v866_v24 = vld [vmem:[#allocation12 + $0x48] sm:$0xff] }
 0x124   :  { %1299 = vmatpush1.bf16.msra.mxu0 %v1298_v25  ;;  %1363 = vmatpush1.bf16.msra.mxu1 %v1362_v30  ;;  %v655_v25 = vld [vmem:[#allocation10 + $0x390] sm:$0xff]  ;;  %v666_v30 = vld [vmem:[#allocation10 + $0x3e8] sm:$0xff] }
 0x125   :  { %1301 = vmatprep.subr.bf16.mxu0 %v1300_v34  ;;  %1365 = vmatprep.subr.bf16.mxu1 %v1364_v35  ;;  %v1382_v31 = vpack.c.bf16 %v659_v27, %v655_v25  ;;  %v1320_v32 = vpack.c.bf16 %v666_v30, %v662_v28  ;;  %v668_v34 = vld [vmem:[#allocation10 + $0x3f8] sm:$0xff]  ;;  %v661_v35 = vld [vmem:[#allocation10 + $0x3c0] sm:$0xff]  ;;  %v1401_v25 = vpack.c.bf16 %v866_v24, %v865_v23 }
 0x126   :  { %v1384_v36 = vpack.c.bf16 %v668_v34, %v664_v33  ;;  %v1322_v40 = vpack.c.bf16 %v665_v37, %v661_v35  ;;  %v868_v27 = vld [vmem:[#allocation12 + $0x58] sm:$0xff]  ;;  %v869_v30 = vld [vmem:[#allocation12 + $0x60] sm:$0xff]  ;;  %v871_v33 = vld [vmem:[#allocation12 + $0x70] sm:$0xff] }
 0x127   :  { %v872_v34 = vld [vmem:[#allocation12 + $0x78] sm:$0xff] }
 0x128   :  { %1303 = vmatpush1.bf16.msra.mxu0 %v1302_v39  ;;  %1367 = vmatpush1.bf16.msra.mxu1 %v1366_v41  ;;  %v667_v39 = vld [vmem:[#allocation10 + $0x3f0] sm:$0xff]  ;;  %v1794_v41 = vld [vmem:[#allocation4 + $0x8] sm:$0xff]  ;;  %v1410_v35 = vpack.c.bf16 %v872_v34, %v871_v33 }
 0x129   :  { %1305 = vmatprep.subr.bf16.mxu0 %v1304_v45  ;;  %1369 = vmatprep.subr.bf16.mxu1 %v1368_v49  ;;  %v1386_v42 = vpack.c.bf16 %v667_v39, %v663_v38  ;;  %v1800_v45 = vshrl.u32 %v105_v17, 7 }
 0x12a   :  { %755 = vmatprep.mubr.f32.mxu0 %v1794_v41  ;;  %826 = vmatprep.mubr.f32.mxu1 %v1794_v41 }
 0x12b   :  { %v366_v46 = vsub.s32 0, %v1800_v45  ;;  %v370_v48 = vsub.s32 1, %v1800_v45  ;;  %v374_v60 = vsub.s32 2, %v1800_v45 }
 0x12c   :  { %1307 = vmatpush1.bf16.msra.mxu0 %v1306_v50  ;;  %1371 = vmatpush1.bf16.msra.mxu1 %v1370_v53 }
 0x12d   :  { %1309 = vmatprep.subr.bf16.mxu0 %v1308_v57  ;;  %1373 = vmatprep.subr.bf16.mxu1 %v1372_v61  ;;  %v367_v49 = vrot.slane %v362_v47, %v366_v46  ;;  %v371_v51 = vrot.slane %v362_v47, %v370_v48  ;;  %v375_v61 = vrot.slane %v362_v47, %v374_v60 }
 0x130   :  { %1311 = vmatpush1.bf16.msra.mxu0 %v1310_v62  ;;  %1375 = vmatpush1.bf16.msra.mxu1 %v1374_v2 }
 0x131   :  { %1313 = vmatprep.subr.bf16.mxu0 %v1312_v6  ;;  %1377 = vmatprep.subr.bf16.mxu1 %v1376_v11 }
 0x134   :  { %1315 = vmatpush1.bf16.msra.mxu0 %v1314_v12  ;;  %1379 = vmatpush1.bf16.msra.mxu1 %v1378_v16  ;;  %v857_v12 = vld [vmem:[#allocation12] sm:$0xff]  ;;  %v860_v16 = vld [vmem:[#allocation12 + $0x18] sm:$0xff] }
 0x135   :  { %1317 = vmatprep.subr.bf16.mxu0 %v1316_v21  ;;  %1381 = vmatprep.subr.bf16.mxu1 %v1380_v22  ;;  %v1389_v14 = vpack.c.bf16 %v858_v13, %v857_v12  ;;  %v1392_v18 = vpack.c.bf16 %v860_v16, %v859_v15  ;;  %v863_v21 = vld [vmem:[#allocation12 + $0x30] sm:$0xff] }
 0x138   :  { %1319 = vmatpush1.bf16.msra.mxu0 %v1318_v26  ;;  %1383 = vmatpush1.bf16.msra.mxu1 %v1382_v31  ;;  %v867_v26 = vld [vmem:[#allocation12 + $0x50] sm:$0xff]  ;;  %v870_v31 = vld [vmem:[#allocation12 + $0x68] sm:$0xff] }
 0x139   :  { %1321 = vmatprep.subr.bf16.mxu0 %v1320_v32  ;;  %1385 = vmatprep.subr.bf16.mxu1 %v1384_v36  ;;  %v1404_v28 = vpack.c.bf16 %v868_v27, %v867_v26  ;;  %v1407_v32 = vpack.c.bf16 %v870_v31, %v869_v30  ;;  %v669_v36 = vld [vmem:[%s1871_s6] sm:$0xf]  ;;  %s1635_s6 = smov [#allocation14]  }
 0x13a   :  { %v674_v37 = vrot.slane %v669_v36, %v366_v46  ;;  %s966_s19 = sshll.u32 %s1635_s6, 4  ;;  %s967_s19 = int_to_ptr.vmem [resolvable:$true] %s966_s19 }
 0x13b   :  { %s1565_s20 = scalar_lea.vmem %s967_s19, 256  ;;  %p1570_p13 = scmp.lt.s32.totalorder %s967_s19, %s967_s19 }
 0x13c   :  { %1323 = vmatpush1.bf16.msra.mxu0 %v1322_v40  ;;  %1387 = vmatpush1.bf16.msra.mxu1 %v1386_v42  ;;  %v678_v40 = vrot.slane %v669_v36, %v370_v48  ;;  %p1566_p12 = scmp.ne.s32.totalorder %s967_s19, %s1565_s20  ;;  %p1571_p0 = scmp.lt.s32.totalorder %s1565_s20, %s1565_s20 }
 0x13d   :  { %1388 = vmatprep.subr.bf16.mxu0 %v1631_v1 }
 0x13e   :  { %p1572_p1 = por %p1571_p0, %p1570_p13 }
 0x140   :  { %p1573_p2 = pnand %p1572_p1, %p1566_p12 }
 0x1b2   :  { %v298_v43 = vpop.f32.mrb[0].mxu1 }
 0x1b3   :  { %v1077_v44 = vpop.f32.mrb[1].mxu1 }
 0x1d2   :  { %v445_v50 = vpop.f32.mrb[0].mxu0  ;;  %v516_v52 = vpop.f32.mrb[2].mxu1 }
 0x1d3   :  { %v446_v53 = vadd.f32 %v445_v50, %v367_v49  ;;  %v447_v54 = vpop.f32.mrb[1].mxu0  ;;  %v1112_v17 = vpop.f32.mrb[3].mxu1  ;;  %v517_v0 = vadd.f32 %v516_v52, %v375_v61  ;;  %v685_v52 = vsub.s32 3, %v1800_v45 }
 0x1d4   :  { %v448_v56 = vadd.f32 %v447_v54, %v371_v51  ;;  %v682_v54 = vrot.slane %v669_v36, %v374_v60 }
 0x1d5   :  { %v987_v55 = vmul.f32 -1.442695, %v446_v53  ;;  %v686_v46 = vrot.slane %v669_v36, %v685_v52 }
 0x1d6   :  { %v988_v57 = vmul.f32 -1.442695, %v448_v56 }
 0x1d7   :  { %1435 = vpow2.f32 %v987_v55 }
 0x1d8   :  { %1437 = vpow2.f32 %v988_v57 }
 0x1e1   :  { %v1436_v58 = vpop.eup %1435 }
 0x1e2   :  { %v528_v59 = vadd.f32 1.0, %v1436_v58  ;;  %v1438_v62 = vpop.eup %1437 }
 0x1e3   :  { %v529_v63 = vadd.f32 1.0, %v1438_v62 }
 0x1e4   :  { %1439 = vrcp.f32 %v528_v59 }
 0x1e5   :  { %1441 = vrcp.f32 %v529_v63 }
 0x1ee   :  { %v1440_v2 = vpop.eup %1439 }
 0x1ef   :  { %v534_v3 = vmul.f32 %v1440_v2, %v517_v0  ;;  %v1442_v5 = vpop.eup %1441 }
 0x1f0   :  { %v537_v6 = vsub.f32 1.0, %v1442_v5  ;;  %v539_v10 = vmul.f32 %v1442_v5, %v1790_v29  ;;  %v861_v29 = vld [vmem:[#allocation12 + $0x20] sm:$0xff] }
 0x1f1   :  { %v535_v4 = vadd.f32 %v534_v3, %v298_v43  ;;  %v1395_v20 = vpack.c.bf16 %v862_v19, %v861_v29 }
 0x1f3   :  { %1443 = vtanh.f32 %v535_v4 }
 0x1fd   :  { %v1444_v7 = vpop.eup %1443 }
 0x1fe   :  { %v538_v8 = vmul.f32 %v1444_v7, %v537_v6 }
 0x200   :  { %v540_v11 = vadd.f32 %v539_v10, %v538_v8 }
 0x202   :  { %756 = vmatmul.mubr.f32.vlgmr.msra.gmra.mrb[2].mxu0 %v540_v11  ;;  %853 = vst [vmem:[#allocation14] sm:$0xff] %v540_v11  ;;  %827 = vmatmul.mubr.f32.vlgmr.msra.gmra.mrb[4].mxu1 %v540_v11 }
 0x203   :  { %1145 = vmatprep.mubr.msk.f32.mxu0 %vm1633_vm0, %v1632_v9  ;;  %1390 = vmatpush3.bf16.msra.mxu0 %v1389_v14  ;;  %v864_v9 = vld [vmem:[#allocation12 + $0x38] sm:$0xff] }
 0x204   :  { %1391 = vmatprep.subr.bf16.mxu0 %v1631_v1  ;;  %v1398_v22 = vpack.c.bf16 %v864_v9, %v863_v21 }
 0x207   :  { %1393 = vmatpush3.bf16.msra.mxu0 %v1392_v18 }
 0x208   :  { %1394 = vmatprep.subr.bf16.mxu0 %v1631_v1 }
 0x20b   :  { %1396 = vmatpush3.bf16.msra.mxu0 %v1395_v20 }
 0x20c   :  { %1397 = vmatprep.subr.bf16.mxu0 %v1631_v1 }
 0x20f   :  { %1399 = vmatpush3.bf16.msra.mxu0 %v1398_v22 }
 0x210   :  { %1400 = vmatprep.subr.bf16.mxu0 %v1631_v1 }
 0x213   :  { %1402 = vmatpush3.bf16.msra.mxu0 %v1401_v25 }
 0x214   :  { %1403 = vmatprep.subr.bf16.mxu0 %v1631_v1 }
 0x217   :  { %1405 = vmatpush3.bf16.msra.mxu0 %v1404_v28 }
 0x218   :  { %1406 = vmatprep.subr.bf16.mxu0 %v1631_v1 }
 0x21b   :  { %1408 = vmatpush3.bf16.msra.mxu0 %v1407_v32 }
 0x21c   :  { %1409 = vmatprep.subr.bf16.mxu0 %v1631_v1 }
 0x21f   :  { %1411 = vmatpush3.bf16.msra.mxu0 %v1410_v35 }
 0x2d5   :  { %v757_v38 = vpop.f32.mrb[2].mxu0  ;;  %v828_v39 = vpop.f32.mrb[4].mxu1 }
 0x2d6   :  { %v758_v42 = vadd.f32 %v757_v38, %v674_v37  ;;  %v759_v43 = vpop.f32.mrb[3].mxu0  ;;  %v830_v44 = vpop.f32.mrb[5].mxu1  ;;  %v829_v56 = vadd.f32 %v828_v39, %v682_v54 }
 0x2d7   :  { %v760_v49 = vadd.f32 %v759_v43, %v678_v40  ;;  %v831_v48 = vadd.f32 %v830_v44, %v686_v46 }
 0x2d8   :  { %v989_v47 = vmul.f32 -1.442695, %v758_v42 }
 0x2d9   :  { %v990_v1 = vmul.f32 -1.442695, %v760_v49 }
 0x2da   :  { %1445 = vpow2.f32 %v989_v47 }
 0x2db   :  { %1447 = vpow2.f32 %v990_v1 }
 0x2e4   :  { %v1446_v50 = vpop.eup %1445 }
 0x2e5   :  { %v839_v51 = vadd.f32 1.0, %v1446_v50  ;;  %v1448_v53 = vpop.eup %1447 }
 0x2e6   :  { %v840_v17 = vadd.f32 1.0, %v1448_v53 }
 0x2e7   :  { %1449 = vrcp.f32 %v839_v51 }
 0x2e8   :  { %1451 = vrcp.f32 %v840_v17 }
 0x2f1   :  { %v1450_v55 = vpop.eup %1449 }
 0x2f2   :  { %v845_v57 = vmul.f32 %v1450_v55, %v831_v48  ;;  %v1452_v59 = vpop.eup %1451 }
 0x2f3   :  { %v848_v61 = vsub.f32 1.0, %v1452_v59  ;;  %v850_v0 = vmul.f32 %v1452_v59, %v1794_v41 }
 0x2f4   :  { %v846_v58 = vadd.f32 %v845_v57, %v829_v56 }
 0x2f6   :  { %1453 = vtanh.f32 %v846_v58 }
 0x300   :  { %v1454_v62 = vpop.eup %1453 }
 0x301   :  { %v849_v63 = vmul.f32 %v1454_v62, %v848_v61 }
 0x303   :  { %v851_v2 = vadd.f32 %v850_v0, %v849_v63 }
 0x305   :  { %1146 = vmatmul.mubr.f32.vlgmr.msra.gmra.mrb[4].mxu0 %v851_v2  ;;  %855 = vst [vmem:[#allocation14 + $0x8] sm:$0xff] %v851_v2 }
 0x306   :  { %1576 = shalt.err (!%p1573_p2)
}
 0x307   :  { %s1577_s26 = scalar_lea.hbm %s1875_s10, 256 }
 0x308   :  { %p1578_p3 = scmp.ne.s32.totalorder %s1875_s10, %s1577_s26  ;;  %p1581_p4 = scmp.lt.u32.totalorder %s1577_s26, %s1875_s10 }
 0x30a   :  { %p1583_p5 = pnand %p1581_p4, %p1578_p3 }
 0x30c   :  { %1586 = shalt.err (!%p1583_p5)
}
 0x30d   :  { %972 = dma.vmem_to_hbm [thread:$0]  %s967_s19, 256, %s1875_s10, [#allocation15], %s1626_s5, %s1626_s5, %s1627_s28  }
 0x30e   :  { %v991_v41 = vld [vmem:[%s1873_s8] ss:$0 sm:$0xff]  ;;  %s1636_s15 = smov [#allocation13]  }
 0x30f   :  { %s957_s16 = sshll.u32 %s1636_s15, 4  ;;  %s958_s16 = int_to_ptr.vmem [resolvable:$true] %s957_s16 }
 0x310   :  { %s1587_s2 = scalar_lea.vmem %s958_s16, 128  ;;  %p1592_p7 = scmp.lt.s32.totalorder %s958_s16, %s958_s16 }
 0x311   :  { %p1588_p6 = scmp.ne.s32.totalorder %s958_s16, %s1587_s2  ;;  %p1593_p8 = scmp.lt.s32.totalorder %s1587_s2, %s1587_s2 }
 0x313   :  { %p1594_p9 = por %p1593_p8, %p1592_p7 }
 0x315   :  { %p1595_p10 = pnand %p1594_p9, %p1588_p6 }
 0x3d8   :  { %v946_v45 = vpop.f32.mrb[4].mxu0 }
 0x3d9   :  { %v947_v60 = vadd.f32 %v991_v41, %v946_v45  ;;  %v1147_v3 = vpop.f32.mrb[5].mxu0 }
 0x3db   :  { %950 = vst [vmem:[#allocation13] sm:$0xff] %v947_v60 }
 0x3dc   :  { %1598 = shalt.err (!%p1595_p10)
}
 0x3dd   :  { %s1599_s5 = scalar_lea.hbm %s1874_s9, 128 }
 0x3de   :  { %p1600_p11 = scmp.ne.s32.totalorder %s1874_s9, %s1599_s5  ;;  %p1603_p12 = scmp.lt.u32.totalorder %s1599_s5, %s1874_s9 }
 0x3e0   :  { %p1605_p13 = pnand %p1603_p12, %p1600_p11 }
 0x3e2   :  { %1608 = shalt.err (!%p1605_p13)
}
 0x3e3   :  { %960 = dma.vmem_to_hbm [thread:$0]  %s958_s16, 128, %s1874_s9, [#allocation6]  }
 0x3e4   :  { %1615 = dma.done.wait [#allocation6], 128  }
 0x3e5   :  { %1616 = vsyncadd [#allocation6], 4294967168 }
 0x3e6   :  { %1617 = dma.done.wait [#allocation15], 256  }
 0x3e7   :  { %1618 = vsyncadd [#allocation15], 4294967040 }
 0x3e8   :  { %979 = vsyncpa [#allocation5], 1 }
 0x3e9   :  { %980 = vsyncpa [#allocation8], 1 }
 0x3ea   :  { %981 = vsyncpa [#allocation11], 1 }
 0x3eb   :  { %982 = vsyncpa [#allocation6], 1 }
 0x3ec   :  { %983 = vsyncpa [#allocation15], 1 }

</bundles_post_ra>
